<compile_context>
chip_gen: v7x
topology: tpu7x:2x2x1
jax: 0.10.0
libtpu: 0.0.40
codegen_flags: <defaults>
</compile_context>

<pallas_src>
import functools

import jax
import jax.numpy as jnp
from jax.experimental import pallas as pl
from jax.experimental.pallas import tpu as pltpu

NUM_CLASSES = 10
FEAT_C = 1280
HID1 = 256
HID2 = 128
OUT_PAD = 128  # final logits padded to one full 128-lane tile


def _head_kernel(feat_ref, pool_ref, w1_ref, b1_ref, w2_ref, b2_ref,
                 w3_ref, b3_ref, out_ref, *, inv_hw):
    # feat_ref: (tb*HW, C) bf16, channel-minor (lane-dense, contiguous DMA).
    # pool_ref: (tb, tb*HW) bf16 block-diagonal ones -> average pool on the MXU
    # with f32 accumulation; no f32 copy of the feature block is materialized.
    pooled = jnp.dot(pool_ref[...], feat_ref[...],
                     preferred_element_type=jnp.float32) * inv_hw       # (tb, C)

    # fc1 + ReLU (f32 weights: head is the trainable part)
    h1 = jnp.dot(pooled, w1_ref[...],
                 preferred_element_type=jnp.float32) + b1_ref[...]      # (tb, 256)
    h1 = jnp.maximum(h1, 0.0)
    # fc2 + ReLU
    h2 = jnp.dot(h1, w2_ref[...],
                 preferred_element_type=jnp.float32) + b2_ref[...]      # (tb, 128)
    h2 = jnp.maximum(h2, 0.0)
    # fc3 (logits padded to 128 lanes -> unmasked lane-dense store)
    out_ref[0] = jnp.dot(h2, w3_ref[...],
                         preferred_element_type=jnp.float32) + b3_ref[...]


def _choose_tb(B, HW, block_batch):
    """Batch rows per grid step: divisor of B (no pad), (tb*HW) sublane-aligned,
    per-buffer feature block <= ~10 MiB, and >=2 grid steps when B > 1."""
    budget_rows = (10 << 20) // (FEAT_C * 2)            # bf16 rows per buffer
    cap = max(1, min(block_batch, budget_rows // max(HW, 1)))
    if B > 1:
        cap = min(cap, (B + 1) // 2)                    # >=2 steps -> both v7x TCs
    for d in range(cap, 0, -1):
        if B % d == 0 and (d * HW) % 8 == 0:
            return d
    return B  # fallback: single full-batch block (block rows == full array dim)


def skin_disease_head(feat_bhwc, params, *, block_batch=32):
    """feat_bhwc: (B, H, W, 1280) backbone features (channel-minor, as a TPU
    backbone emits them). Returns (B, NUM_CLASSES) logits."""
    B, H, W, C = feat_bhwc.shape
    assert C == FEAT_C
    HW = H * W
    w1, b1, w2, b2, w3, b3 = params

    # Frozen backbone -> bf16 features; no-op if already bf16 (no extra HBM pass).
    feat = feat_bhwc if feat_bhwc.dtype == jnp.bfloat16 else feat_bhwc.astype(jnp.bfloat16)
    feat2d = feat.reshape(B * HW, C)                    # free, row-major contiguous

    tb = _choose_tb(B, HW, block_batch)
    nblk = B // tb
    feat_rows = tb * HW

    # Block-diagonal pooling matrix (ones, exact in bf16): P[i, j] = (j // HW == i).
    row = jnp.arange(tb, dtype=jnp.int32)[:, None]
    col = jnp.arange(feat_rows, dtype=jnp.int32)[None, :] // HW
    pool = (row == col).astype(jnp.bfloat16)            # (tb, tb*HW)

    # Pad the final layer to a full 128-lane output tile.
    w3p = jnp.pad(w3, ((0, 0), (0, OUT_PAD - NUM_CLASSES)))
    b3p = jnp.pad(b3, ((0, 0), (0, OUT_PAD - NUM_CLASSES)))

    weight_bytes = (C * HID1 + HID1 + HID1 * HID2 + HID2 + HID2 * OUT_PAD + OUT_PAD) * 4
    vmem_limit = int(2 * feat_rows * C * 2              # double-buffered feature block
                     + 2 * tb * feat_rows * 2           # pool matrix
                     + 2 * weight_bytes                 # resident weights (dbl-buffered)
                     + 2 * tb * OUT_PAD * 4             # output block
                     + (8 << 20))                       # headroom

    kernel = functools.partial(_head_kernel, inv_hw=1.0 / HW)

    out = pl.pallas_call(
        kernel,
        out_shape=jax.ShapeDtypeStruct((nblk, tb, OUT_PAD), jnp.float32),
        grid=(nblk,),
        in_specs=[
            pl.BlockSpec((feat_rows, C), lambda i: (i, 0)),   # features: tiled on batch
            pl.BlockSpec((tb, feat_rows), lambda i: (0, 0)),  # pool matrix resident
            pl.BlockSpec((FEAT_C, HID1), lambda i: (0, 0)),   # weights resident
            pl.BlockSpec((1, HID1), lambda i: (0, 0)),
            pl.BlockSpec((HID1, HID2), lambda i: (0, 0)),
            pl.BlockSpec((1, HID2), lambda i: (0, 0)),
            pl.BlockSpec((HID2, OUT_PAD), lambda i: (0, 0)),
            pl.BlockSpec((1, OUT_PAD), lambda i: (0, 0)),
        ],
        out_specs=pl.BlockSpec((1, tb, OUT_PAD), lambda i: (i, 0, 0)),
        compiler_params=pltpu.CompilerParams(
            dimension_semantics=("parallel",),                # shards steps on v7x's 2 TCs
            vmem_limit_bytes=vmem_limit),
    )(feat2d, pool, w1, b1, w2, b2, w3p, b3p)

    return out.reshape(B, OUT_PAD)[:, :NUM_CLASSES]


def init_params(key):
    """Deterministic init mimicking nn.Linear (uniform(-1/sqrt(fan_in), ...)).
    Weights stored as (in, out) == W.T relative to PyTorch's (out, in)."""
    ks = jax.random.split(key, 6)

    def linear(kw, kb, fan_in, fan_out):
        bound = 1.0 / jnp.sqrt(fan_in)
        w = jax.random.uniform(kw, (fan_in, fan_out), jnp.float32, -bound, bound)
        b = jax.random.uniform(kb, (1, fan_out), jnp.float32, -bound, bound)
        return w, b

    w1, b1 = linear(ks[0], ks[1], FEAT_C, HID1)
    w2, b2 = linear(ks[2], ks[3], HID1, HID2)
    w3, b3 = linear(ks[4], ks[5], HID2, NUM_CLASSES)
    return (w1, b1, w2, b2, w3, b3)


def _reference(feat_bhwc, params):
    # Same math as the PyTorch head on the bf16 backbone features
    # (pool/matmuls in f32), so the check isolates kernel numerics.
    w1, b1, w2, b2, w3, b3 = params
    f = feat_bhwc.astype(jnp.bfloat16).astype(jnp.float32)
    pooled = jnp.mean(f, axis=(1, 2))                    # (B, C)
    h1 = jnp.maximum(pooled @ w1 + b1, 0.0)
    h2 = jnp.maximum(h1 @ w2 + b2, 0.0)
    return h2 @ w3 + b3


if __name__ == "__main__":
    key = jax.random.PRNGKey(0)
    k_feat, k_params = jax.random.split(key)

    # Small synthetic backbone feature map: batch=2, spatial=4x4, channels=1280,
    # channel-minor bf16 exactly as a frozen TPU backbone would emit it.
    B, H, W = 2, 4, 4
    feats = jax.random.normal(
        k_feat, (B, H, W, FEAT_C), jnp.float32).astype(jnp.bfloat16)
    params = init_params(k_params)

    out = jax.block_until_ready(skin_disease_head(feats, params))

    ref = _reference(feats, params)
    assert out.shape == (B, NUM_CLASSES)
    assert jnp.allclose(out, ref, atol=2e-3, rtol=2e-3), \
        float(jnp.max(jnp.abs(out - ref)))

    print("KERNEL_OK")
</pallas_src>

<mosaic_0001>
module attributes {stable_mosaic.version = 11 : i64} {
  func.func @_head_kernel(%arg0: i32, %arg1: memref<16x1280xbf16, #tpu.memory_space<vmem>>, %arg2: memref<1x16xbf16, #tpu.memory_space<vmem>>, %arg3: memref<1280x256xf32, #tpu.memory_space<vmem>>, %arg4: memref<1x256xf32, #tpu.memory_space<vmem>>, %arg5: memref<256x128xf32, #tpu.memory_space<vmem>>, %arg6: memref<1x128xf32, #tpu.memory_space<vmem>>, %arg7: memref<128x128xf32, #tpu.memory_space<vmem>>, %arg8: memref<1x128xf32, #tpu.memory_space<vmem>>, %arg9: memref<1x1x128xf32, #tpu.memory_space<vmem>>) attributes {dimension_semantics = [#tpu.dimension_semantics<parallel>], iteration_bounds = array<i64: 2>, scalar_prefetch = 0 : i64, scratch_operands = 0 : i64, tpu.core_type = #tpu.core_type<tc>, window_params = [{transform_indices = @transform_0, window_bounds = array<i64: 16, 1280>}, {pipeline_mode = #tpu.pipeline_mode<synchronous>, transform_indices = @transform_1, window_bounds = array<i64: 1, 16>}, {pipeline_mode = #tpu.pipeline_mode<synchronous>, transform_indices = @transform_2, window_bounds = array<i64: 1280, 256>}, {pipeline_mode = #tpu.pipeline_mode<synchronous>, transform_indices = @transform_3, window_bounds = array<i64: 1, 256>}, {pipeline_mode = #tpu.pipeline_mode<synchronous>, transform_indices = @transform_4, window_bounds = array<i64: 256, 128>}, {pipeline_mode = #tpu.pipeline_mode<synchronous>, transform_indices = @transform_5, window_bounds = array<i64: 1, 128>}, {pipeline_mode = #tpu.pipeline_mode<synchronous>, transform_indices = @transform_6, window_bounds = array<i64: 128, 128>}, {pipeline_mode = #tpu.pipeline_mode<synchronous>, transform_indices = @transform_7, window_bounds = array<i64: 1, 128>}, {transform_indices = @transform_8, window_bounds = array<i64: 1, 1, 128>}]} {
    %c0 = arith.constant 0 : index
    %c0_0 = arith.constant 0 : index
    %0 = vector.load %arg2[%c0, %c0_0] : memref<1x16xbf16, #tpu.memory_space<vmem>>, vector<1x16xbf16>
    %c0_1 = arith.constant 0 : index
    %c0_2 = arith.constant 0 : index
    %1 = vector.load %arg1[%c0_1, %c0_2] : memref<16x1280xbf16, #tpu.memory_space<vmem>>, vector<16x1280xbf16>
    %cst = arith.constant dense<0.000000e+00> : vector<1x1280xf32>
    %2 = tpu.matmul %0, %1, %cst {dimension_numbers = #tpu.dot_dimension_numbers<[1], [0], [0], [1], [0, 0, 1, 1], [], []>} : vector<1x16xbf16>, vector<16x1280xbf16>, vector<1x1280xf32> -> vector<1x1280xf32>
    %cst_3 = arith.constant 6.250000e-02 : f32
    %3 = vector.broadcast %cst_3 : f32 to vector<1x1280xf32>
    %4 = arith.mulf %2, %3 : vector<1x1280xf32>
    %c0_4 = arith.constant 0 : index
    %c0_5 = arith.constant 0 : index
    %5 = vector.load %arg3[%c0_4, %c0_5] : memref<1280x256xf32, #tpu.memory_space<vmem>>, vector<1280x256xf32>
    %cst_6 = arith.constant dense<0.000000e+00> : vector<1x256xf32>
    %6 = tpu.matmul %4, %5, %cst_6 {dimension_numbers = #tpu.dot_dimension_numbers<[1], [0], [0], [1], [0, 0, 1, 1], [], []>} : vector<1x1280xf32>, vector<1280x256xf32>, vector<1x256xf32> -> vector<1x256xf32>
    %c0_7 = arith.constant 0 : index
    %c0_8 = arith.constant 0 : index
    %7 = vector.load %arg4[%c0_7, %c0_8] : memref<1x256xf32, #tpu.memory_space<vmem>>, vector<1x256xf32>
    %8 = arith.addf %6, %7 : vector<1x256xf32>
    %cst_9 = arith.constant 0.000000e+00 : f32
    %9 = vector.broadcast %cst_9 : f32 to vector<1x256xf32>
    %10 = arith.maximumf %8, %9 : vector<1x256xf32>
    %c0_10 = arith.constant 0 : index
    %c0_11 = arith.constant 0 : index
    %11 = vector.load %arg5[%c0_10, %c0_11] : memref<256x128xf32, #tpu.memory_space<vmem>>, vector<256x128xf32>
    %cst_12 = arith.constant dense<0.000000e+00> : vector<1x128xf32>
    %12 = tpu.matmul %10, %11, %cst_12 {dimension_numbers = #tpu.dot_dimension_numbers<[1], [0], [0], [1], [0, 0, 1, 1], [], []>} : vector<1x256xf32>, vector<256x128xf32>, vector<1x128xf32> -> vector<1x128xf32>
    %c0_13 = arith.constant 0 : index
    %c0_14 = arith.constant 0 : index
    %13 = vector.load %arg6[%c0_13, %c0_14] : memref<1x128xf32, #tpu.memory_space<vmem>>, vector<1x128xf32>
    %14 = arith.addf %12, %13 : vector<1x128xf32>
    %cst_15 = arith.constant 0.000000e+00 : f32
    %15 = vector.broadcast %cst_15 : f32 to vector<1x128xf32>
    %16 = arith.maximumf %14, %15 : vector<1x128xf32>
    %c0_16 = arith.constant 0 : index
    %c0_17 = arith.constant 0 : index
    %17 = vector.load %arg7[%c0_16, %c0_17] : memref<128x128xf32, #tpu.memory_space<vmem>>, vector<128x128xf32>
    %cst_18 = arith.constant dense<0.000000e+00> : vector<1x128xf32>
    %18 = tpu.matmul %16, %17, %cst_18 {dimension_numbers = #tpu.dot_dimension_numbers<[1], [0], [0], [1], [0, 0, 1, 1], [], []>} : vector<1x128xf32>, vector<128x128xf32>, vector<1x128xf32> -> vector<1x128xf32>
    %c0_19 = arith.constant 0 : index
    %c0_20 = arith.constant 0 : index
    %19 = vector.load %arg8[%c0_19, %c0_20] : memref<1x128xf32, #tpu.memory_space<vmem>>, vector<1x128xf32>
    %20 = arith.addf %18, %19 : vector<1x128xf32>
    %c0_21 = arith.constant 0 : index
    %c0_22 = arith.constant 0 : index
    %c0_23 = arith.constant 0 : index
    %21 = vector.load %arg9[%c0_21, %c0_22, %c0_23] : memref<1x1x128xf32, #tpu.memory_space<vmem>>, vector<1x1x128xf32>
    %22 = vector.shape_cast %21 : vector<1x1x128xf32> to vector<1x128xf32>
    %23 = vector.shape_cast %20 : vector<1x128xf32> to vector<1x1x128xf32>
    tpu.vector_store %arg9[%c0_21, %c0_22, %c0_23], %23 {strides = array<i32>} : memref<1x1x128xf32, #tpu.memory_space<vmem>>, vector<1x1x128xf32>,
    return
  }
  func.func @transform_0(%arg0: i32) -> (i32, i32) {
    %c0_i32 = arith.constant 0 : i32
    %c0_i32_0 = arith.constant 0 : i32
    return %arg0, %c0_i32 : i32, i32
  }
  func.func @transform_1(%arg0: i32) -> (i32, i32) {
    %c0_i32 = arith.constant 0 : i32
    %c0_i32_0 = arith.constant 0 : i32
    %c0_i32_1 = arith.constant 0 : i32
    return %c0_i32, %c0_i32_0 : i32, i32
  }
  func.func @transform_2(%arg0: i32) -> (i32, i32) {
    %c0_i32 = arith.constant 0 : i32
    %c0_i32_0 = arith.constant 0 : i32
    %c0_i32_1 = arith.constant 0 : i32
    return %c0_i32, %c0_i32_0 : i32, i32
  }
  func.func @transform_3(%arg0: i32) -> (i32, i32) {
    %c0_i32 = arith.constant 0 : i32
    %c0_i32_0 = arith.constant 0 : i32
    %c0_i32_1 = arith.constant 0 : i32
    return %c0_i32, %c0_i32_0 : i32, i32
  }
  func.func @transform_4(%arg0: i32) -> (i32, i32) {
    %c0_i32 = arith.constant 0 : i32
    %c0_i32_0 = arith.constant 0 : i32
    %c0_i32_1 = arith.constant 0 : i32
    return %c0_i32, %c0_i32_0 : i32, i32
  }
  func.func @transform_5(%arg0: i32) -> (i32, i32) {
    %c0_i32 = arith.constant 0 : i32
    %c0_i32_0 = arith.constant 0 : i32
    %c0_i32_1 = arith.constant 0 : i32
    return %c0_i32, %c0_i32_0 : i32, i32
  }
  func.func @transform_6(%arg0: i32) -> (i32, i32) {
    %c0_i32 = arith.constant 0 : i32
    %c0_i32_0 = arith.constant 0 : i32
    %c0_i32_1 = arith.constant 0 : i32
    return %c0_i32, %c0_i32_0 : i32, i32
  }
  func.func @transform_7(%arg0: i32) -> (i32, i32) {
    %c0_i32 = arith.constant 0 : i32
    %c0_i32_0 = arith.constant 0 : i32
    %c0_i32_1 = arith.constant 0 : i32
    return %c0_i32, %c0_i32_0 : i32, i32
  }
  func.func @transform_8(%arg0: i32) -> (i32, i32, i32) {
    %c0_i32 = arith.constant 0 : i32
    %c0_i32_0 = arith.constant 0 : i32
    %c0_i32_1 = arith.constant 0 : i32
    return %arg0, %c0_i32, %c0_i32_0 : i32, i32, i32
  }
}

</mosaic_0001>

<bundles_post_ra>
// kernel: tpu_custom_call.1
= control target key start
LH: loop header
LB: loop body
LE: loop exit
PB: predicated region body
PF: predicated region fallthrough
CT: control target
= control target key end

     0   :  { %s3139_s0 = inlined_call_operand.hbm [shape: bf16[32,1280], index: 0, kind: input, shape index: {}]   ;;  %s3140_s1 = inlined_call_operand.hbm [shape: bf16[1,16], index: 1, kind: input, shape index: {}]   ;;  %s3141_s2 = inlined_call_operand.hbm [shape: f32[1280,256], index: 2, kind: input, shape index: {}]   ;;  %s3142_s3 = inlined_call_operand.hbm [shape: f32[1,256], index: 3, kind: input, shape index: {}]   ;;  %s3143_s4 = inlined_call_operand.hbm [shape: f32[256,128], index: 4, kind: input, shape index: {}]   ;;  %s3144_s5 = inlined_call_operand.hbm [shape: f32[1,128], index: 5, kind: input, shape index: {}]   ;;  %s3145_s6 = inlined_call_operand.hbm [shape: f32[128,128], index: 6, kind: input, shape index: {}]   ;;  %s3146_s7 = inlined_call_operand.hbm [shape: f32[1,128], index: 7, kind: input, shape index: {}]   ;;  %s3147_s8 = inlined_call_operand.hbm [shape: f32[2,1,128], index: 8, kind: output, shape index: {}]  }
   0x1   :  { %3151 = sst [smem:[#allocation23_spill]] %s3140_s1 }
   0x2   :  { %3152 = sst [smem:[#allocation24_spill]] %s3141_s2 }
   0x3   :  { %13 = vsyncpa [#allocation3], 0 }
   0x4   :  { %15 = vsyncpa [#allocation3 + $0x1], 0 }
   0x5   :  { %16 = vsyncpa [#allocation6], 0 }
   0x6   :  { %17 = vsyncpa [#allocation9], 0 }
   0x7   :  { %18 = vsyncpa [#allocation12], 0 }
   0x8   :  { %19 = vsyncpa [#allocation15], 0 }
   0x9   :  { %20 = vsyncpa [#allocation4], 0 }
   0xa   :  { %22 = vsyncpa [#allocation4 + $0x1], 0  ;;  %s2758_s27 = smov 0   ;;  %s2760_s28 = smov 0  }
   0xb   :  { %s2762_s29 = smov 0   ;;  %s2764_s30 = smov 0  }
   0xc LB: > { %s2694_s9 = smov [#allocation5]   ;;  %s2779_s11 = sadd.s32 4294967295, %s2692_s30   ;;  %s2692_s30 = sphi %s2764_s30, %s3178_s30   ;;  %s2688_s29 = sphi %s2762_s29, %s3177_s29   ;;  %s2684_s28 = sphi %s2760_s28, %s3176_s28   ;;  %s2680_s27 = sphi %s2758_s27, %s3175_s27  }
   0xd   : > { %s245_s10 = sshll.u32 %s2694_s9, 4  ;;  %p1728_p0 = scmp.ge.s32.totalorder %s2692_s30, 1  ;;  %s2784_s10 = int_to_ptr.vmem [resolvable:$true] %s245_s10 }
   0xe   : > { %p3148_p1 = scmp.eq.s32.totalorder %s2779_s11, 0  ;;  %p232_p2 = scmp.lt.s32.totalorder %s2692_s30, 3 }
   0xf   : > { %s2695_s13 = smov [#allocation8]   ;;  %s2696_s15 = smov [#allocation11]  }
  0x10   : > { %p2786_p3 = pnand %p1728_p0, %p232_p2  ;;  %s269_s14 = sshll.u32 %s2695_s13, 4  ;;  %s2793_s14 = int_to_ptr.vmem [resolvable:$true] %s269_s14 }
  0x11   : > { %s293_s16 = sshll.u32 %s2696_s15, 4  ;;  %s2697_s18 = smov [#allocation7]   ;;  %s2801_s16 = int_to_ptr.vmem [resolvable:$true] %s293_s16 }
  0x12   : > { %s3153_s12 = scalar_select %p2786_p3, 1, 0 }
  0x13   : > { %p2274_p5 = pneg %p2786_p3  ;;  %s2803_s19 = sshll.u32 %s2697_s18, 4  ;;  %s256_s19 = int_to_ptr.vmem [resolvable:$true] %s2803_s19 }
  0x14   : > { %s3155_s1 = sld [smem:[#allocation23_spill]] }
  0x15   : > { %p2797_p6 = pnand %p2274_p5, %p3148_p1 }
  0x17   : > { %p2813_p8 = pneg %p2797_p6 }
  0x1a   : > { %s2384_s22 = scalar_lea.hbm %s3155_s1, 16 }
  0x1b   : > { %p2385_p7 = scmp.ne.s32.totalorder %s3155_s1, %s2384_s22  ;;  %p2391_p11 = scmp.lt.u32.totalorder %s2384_s22, %s3155_s1 }
  0x1d   : > { %p2387_p9 = pnand %p2813_p8, %p2385_p7 }
  0x1f   : > { %p2388_p10 = pneg %p2387_p9 }
  0x21   : > { %p2393_p12 = pnand %p2391_p11, %p2388_p10 }
  0x23   : > { %2396 = shalt.err (!%p2393_p12)
}
  0x24   : > { %s2397_s13 = scalar_lea.vmem %s2784_s10, 16  ;;  %s2404_s15 = scalar_lea.vmem %s2784_s10, 32 }
  0x25   : > { %p2398_p13 = scmp.ne.s32.totalorder %s2784_s10, %s2397_s13  ;;  %p2405_p5 = scmp.lt.s32.totalorder %s2784_s10, %s2784_s10 }
  0x26   : > { %p2406_p7 = scmp.lt.s32.totalorder %s2404_s15, %s2397_s13 }
  0x27   : > { %p2400_p0 = pnand %p2398_p13, %p2813_p8 }
  0x28   : > { %p2407_p9 = por %p2406_p7, %p2405_p5 }
  0x29   : > { %p2401_p2 = pneg %p2400_p0 }
  0x2b   : > { %p2408_p4 = pnand %p2407_p9, %p2401_p2 }
  0x2d   : > { %2411 = shalt.err (!%p2408_p4)
}
  0x2e   : > { %2277 = dma.hbm_to_vmem [thread:$0]  (!%p2797_p6), %s3155_s1, 16, %s2784_s10, [#allocation6]  }
  0x2f   : > { %s2412_s23 = scalar_lea.hbm %s3142_s3, 32 }
  0x30   : > { %p2413_p10 = scmp.ne.s32.totalorder %s3142_s3, %s2412_s23  ;;  %p2419_p4 = scmp.lt.u32.totalorder %s2412_s23, %s3142_s3 }
  0x32   : > { %p2415_p11 = pnand %p2413_p10, %p2813_p8 }
  0x34   : > { %p2416_p12 = pneg %p2415_p11 }
  0x36   : > { %p2421_p13 = pnand %p2419_p4, %p2416_p12 }
  0x38   : > { %2424 = shalt.err (!%p2421_p13)
}
  0x39   : > { %s2425_s10 = scalar_lea.vmem %s2793_s14, 32  ;;  %p2433_p7 = scmp.lt.s32.totalorder %s2793_s14, %s2793_s14 }
  0x3a   : > { %p2426_p0 = scmp.ne.s32.totalorder %s2793_s14, %s2425_s10  ;;  %p2434_p9 = scmp.lt.s32.totalorder %s2425_s10, %s2425_s10 }
  0x3c   : > { %p2428_p2 = pnand %p2426_p0, %p2813_p8  ;;  %p2435_p10 = por %p2434_p9, %p2433_p7 }
  0x3e   : > { %p2429_p5 = pneg %p2428_p2 }
  0x40   : > { %p2436_p11 = pnand %p2435_p10, %p2429_p5 }
  0x42   : > { %2439 = shalt.err (!%p2436_p11)
}
  0x43   : > { %2283 = dma.hbm_to_vmem [thread:$0]  (!%p2797_p6), %s3142_s3, 32, %s2793_s14, [#allocation9]  }
  0x44   : > { %s2440_s22 = scalar_lea.hbm %s3144_s5, 16 }
  0x45   : > { %p2441_p12 = scmp.ne.s32.totalorder %s3144_s5, %s2440_s22  ;;  %p2447_p0 = scmp.lt.u32.totalorder %s2440_s22, %s3144_s5 }
  0x47   : > { %p2443_p4 = pnand %p2441_p12, %p2813_p8 }
  0x49   : > { %p2444_p13 = pneg %p2443_p4 }
  0x4b   : > { %p2449_p2 = pnand %p2447_p0, %p2444_p13 }
  0x4d   : > { %2452 = shalt.err (!%p2449_p2)
}
  0x4e   : > { %s2453_s14 = scalar_lea.vmem %s2801_s16, 16  ;;  %s2460_s13 = scalar_lea.vmem %s2801_s16, 32 }
  0x4f   : > { %p2454_p5 = scmp.ne.s32.totalorder %s2801_s16, %s2453_s14  ;;  %p2461_p10 = scmp.lt.s32.totalorder %s2801_s16, %s2801_s16 }
  0x50   : > { %p2462_p11 = scmp.lt.s32.totalorder %s2460_s13, %s2453_s14 }
  0x51   : > { %p2456_p7 = pnand %p2454_p5, %p2813_p8 }
  0x52   : > { %p2463_p12 = por %p2462_p11, %p2461_p10 }
  0x53   : > { %p2457_p9 = pneg %p2456_p7 }
  0x55   : > { %p2464_p4 = pnand %p2463_p12, %p2457_p9 }
  0x57   : > { %2467 = shalt.err (!%p2464_p4)
}
  0x58   : > { %2289 = dma.hbm_to_vmem [thread:$0]  (!%p2797_p6), %s3144_s5, 16, %s2801_s16, [#allocation12]  }
  0x59   : > { %s3157_s2 = sld [smem:[#allocation24_spill]] }
  0x5f   : > { %s2468_s21 = scalar_lea.hbm %s3157_s2, 40960 }
  0x60   : > { %p2469_p13 = scmp.ne.s32.totalorder %s3157_s2, %s2468_s21  ;;  %p2475_p5 = scmp.lt.u32.totalorder %s2468_s21, %s3157_s2 }
  0x62   : > { %p2471_p0 = pnand %p2469_p13, %p2813_p8 }
  0x64   : > { %p2472_p2 = pneg %p2471_p0 }
  0x66   : > { %p2477_p7 = pnand %p2475_p5, %p2472_p2 }
  0x68   : > { %2480 = shalt.err (!%p2477_p7)
}
  0x69   : > { %s2481_s9 = scalar_lea.vmem %s256_s19, 40960  ;;  %p2489_p12 = scmp.lt.s32.totalorder %s256_s19, %s256_s19 }
  0x6a   : > { %p2482_p9 = scmp.ne.s32.totalorder %s256_s19, %s2481_s9  ;;  %p2490_p4 = scmp.lt.s32.totalorder %s2481_s9, %s2481_s9 }
  0x6c   : > { %p2484_p10 = pnand %p2482_p9, %p2813_p8  ;;  %p2491_p1 = por %p2490_p4, %p2489_p12 }
  0x6e   : > { %p2485_p11 = pneg %p2484_p10 }
  0x70   : > { %p2492_p3 = pnand %p2491_p1, %p2485_p11 }
  0x72   : > { %2495 = shalt.err (!%p2492_p3)
}
  0x73   : > { %s2698_s16 = smov 256   ;;  %s2699_s14 = smov 16  }
  0x74   : > { %2280 = dma.hbm_to_vmem [thread:$0]  (!%p2797_p6), %s3157_s2, 40960, %s256_s19, [#allocation6], %s2698_s16, %s2698_s16, %s2699_s14  }
  0x75   : > { %s2700_s15 = smov [#allocation10]   ;;  %s2496_s22 = scalar_lea.hbm %s3143_s4, 4096 }
  0x76   : > { %s279_s18 = sshll.u32 %s2700_s15, 4  ;;  %p2497_p1 = scmp.ne.s32.totalorder %s3143_s4, %s2496_s22  ;;  %s280_s18 = int_to_ptr.vmem [resolvable:$true] %s279_s18 }
  0x77   : > { %p2503_p0 = scmp.lt.u32.totalorder %s2496_s22, %s3143_s4 }
  0x78   : > { %p2499_p3 = pnand %p2497_p1, %p2813_p8 }
  0x7a   : > { %p2500_p13 = pneg %p2499_p3 }
  0x7c   : > { %p2505_p2 = pnand %p2503_p0, %p2500_p13 }
  0x7e   : > { %2508 = shalt.err (!%p2505_p2)
}
  0x7f   : > { %s2509_s19 = scalar_lea.vmem %s280_s18, 4096  ;;  %p2517_p10 = scmp.lt.s32.totalorder %s280_s18, %s280_s18 }
  0x80   : > { %p2510_p5 = scmp.ne.s32.totalorder %s280_s18, %s2509_s19  ;;  %p2518_p11 = scmp.lt.s32.totalorder %s2509_s19, %s2509_s19 }
  0x82   : > { %p2512_p7 = pnand %p2510_p5, %p2813_p8  ;;  %p2519_p12 = por %p2518_p11, %p2517_p10 }
  0x84   : > { %p2513_p9 = pneg %p2512_p7 }
  0x86   : > { %p2520_p4 = pnand %p2519_p12, %p2513_p9 }
  0x88   : > { %2523 = shalt.err (!%p2520_p4)
}
  0x89   : > { %s2701_s16 = smov 128   ;;  %s2702_s14 = smov 8  }
  0x8a   : > { %2286 = dma.hbm_to_vmem [thread:$0]  (!%p2797_p6), %s3143_s4, 4096, %s280_s18, [#allocation9], %s2701_s16, %s2701_s16, %s2702_s14  }
  0x8b   : > { %s2703_s15 = smov [#allocation13]   ;;  %s2704_s21 = smov [#allocation14]  }
  0x8c   : > { %s303_s20 = sshll.u32 %s2703_s15, 4  ;;  %s317_s22 = sshll.u32 %s2704_s21, 4  ;;  %s304_s20 = int_to_ptr.vmem [resolvable:$true] %s303_s20  ;;  %s318_s22 = int_to_ptr.vmem [resolvable:$true] %s317_s22 }
  0x8d   : > { %s2524_s26 = scalar_lea.hbm %s3145_s6, 2048 }
  0x8e   : > { %p2525_p1 = scmp.ne.s32.totalorder %s3145_s6, %s2524_s26  ;;  %p2531_p0 = scmp.lt.u32.totalorder %s2524_s26, %s3145_s6 }
  0x90   : > { %p2527_p3 = pnand %p2525_p1, %p2813_p8 }
  0x92   : > { %p2528_p13 = pneg %p2527_p3 }
  0x94   : > { %p2533_p2 = pnand %p2531_p0, %p2528_p13 }
  0x96   : > { %2536 = shalt.err (!%p2533_p2)
}
  0x97   : > { %s2537_s18 = scalar_lea.vmem %s304_s20, 2048  ;;  %p2545_p10 = scmp.lt.s32.totalorder %s304_s20, %s304_s20 }
  0x98   : > { %p2538_p5 = scmp.ne.s32.totalorder %s304_s20, %s2537_s18  ;;  %p2546_p11 = scmp.lt.s32.totalorder %s2537_s18, %s2537_s18 }
  0x9a   : > { %p2540_p7 = pnand %p2538_p5, %p2813_p8  ;;  %p2547_p12 = por %p2546_p11, %p2545_p10 }
  0x9c   : > { %p2541_p9 = pneg %p2540_p7 }
  0x9e   : > { %p2548_p4 = pnand %p2547_p12, %p2541_p9 }
  0xa0   : > { %2551 = shalt.err (!%p2548_p4)
}
  0xa1   : > { %2292 = dma.hbm_to_vmem [thread:$0]  (!%p2797_p6), %s3145_s6, 2048, %s304_s20, [#allocation12], %s2701_s16, %s2701_s16, %s2702_s14  }
  0xa2   : > { %s2552_s15 = scalar_lea.hbm %s3146_s7, 16 }
  0xa3   : > { %p2553_p1 = scmp.ne.s32.totalorder %s3146_s7, %s2552_s15  ;;  %p2559_p0 = scmp.lt.u32.totalorder %s2552_s15, %s3146_s7 }
  0xa5   : > { %p2555_p3 = pnand %p2553_p1, %p2813_p8 }
  0xa7   : > { %p2556_p13 = pneg %p2555_p3 }
  0xa9   : > { %p2561_p2 = pnand %p2559_p0, %p2556_p13 }
  0xab   : > { %2564 = shalt.err (!%p2561_p2)
}
  0xac   : > { %s2565_s9 = scalar_lea.vmem %s318_s22, 16  ;;  %s2572_s16 = scalar_lea.vmem %s318_s22, 32 }
  0xad   : > { %p2566_p5 = scmp.ne.s32.totalorder %s318_s22, %s2565_s9  ;;  %p2573_p10 = scmp.lt.s32.totalorder %s318_s22, %s318_s22 }
  0xae   : > { %p2574_p11 = scmp.lt.s32.totalorder %s2572_s16, %s2565_s9 }
  0xaf   : > { %p2568_p7 = pnand %p2566_p5, %p2813_p8 }
  0xb0   : > { %p2575_p12 = por %p2574_p11, %p2573_p10 }
  0xb1   : > { %p2569_p9 = pneg %p2568_p7 }
  0xb3   : > { %p2576_p4 = pnand %p2575_p12, %p2569_p9 }
  0xb5   : > { %2579 = shalt.err (!%p2576_p4)
}
  0xb6   : > { %2295 = dma.hbm_to_vmem [thread:$0]  (!%p2797_p6), %s3146_s7, 16, %s318_s22, [#allocation15]  }
  0xb7   : > { %s1727_s25 = sadd.s32 4294967294, %s2692_s30   ;;  %s2957_s17 = sadd.s32 1, %s2692_s30  }
  0xb8   : > { %s35_s19 = sadd.s32 1, %s2688_s29  ;;  %s32_s18 = ssub.s32 %s2692_s30, %s2957_s17 }
  0xb9   : > { %p42_p8 = scmp.ne.s32.totalorder %s2688_s29, %s2684_s28  ;;  %p33_p1 = scmp.eq.s32.totalorder %s32_s18, 0 }
  0xba   : > { %p43_p3 = scmp.eq.s32.totalorder %s2692_s30, 0  ;;  %p48_p13 = scmp.ne.s32.totalorder %s2684_s28, %s2680_s27 }
  0xbb   : > { %p219_p0 = scmp.eq.s32.totalorder %s2779_s11, 1  ;;  %p3158_p5 = scmp.eq.s32.totalorder %s2779_s11, 0 }
  0xbc   : > { %s2969_s13 = scalar_select %p33_p1, %s2688_s29, %s35_s19  }
  0xbd   : > { %p44_p2 = por %p43_p3, %p42_p8  ;;  %p2973_p7 = por %p3158_p5, %p48_p13 }
  0xbe   : > { %p2977_p6 = por %p219_p0, %p42_p8  ;;  %p225_p9 = scmp.eq.s32.totalorder %s1727_s25, 1 }
  0xbf   : > { %p2311_p10 = scmp.lt.s32.totalorder %s2692_s30, 2  ;;  %s328_s1 = sand.u32 1, %s2688_s29  }
  0xc0   : > { %s3160_s22 = scalar_select %p2977_p6, 1, 0 }
  0xc1   : > { %p2983_p11 = por %p225_p9, %p48_p13  ;;  %s2239_s15 = smul.u32 80, %s328_s1 }
  0xc2   : > { %p2987_p12 = pnand %p2311_p10, %p44_p2  ;;  %s2240_s23 = smul.u32 1280, %s2692_s30 }
  0xc3   : > { %s3161_s2 = scalar_select %p2983_p11, 1, 0 }
  0xc4   : > { %s2995_s9 = scalar_lea.hbm %s3139_s0, %s2240_s23  ;;  %s332_s16 = scalar_lea.vmem [#allocation2], %s2239_s15 }
  0xc5   : > { %s340_s14 = sshll.u32 %s332_s16, 4  ;;  %s2999_s20 = scalar_lea.sflag [#allocation3], %s328_s1  ;;  %s2997_s14 = int_to_ptr.vmem [resolvable:$true] %s340_s14 }
  0xc6   : > { %s2580_s25 = scalar_lea.hbm %s2995_s9, 1280  ;;  %p2582_p8 = pneg %p2987_p12 }
  0xc7   : > { %p2581_p4 = scmp.ne.s32.totalorder %s2995_s9, %s2580_s25  ;;  %s2585_s23 = scalar_lea.hbm %s3139_s0, 2560 }
  0xc8   : > { %p2586_p13 = scmp.lt.u32.totalorder %s2995_s9, %s3139_s0  ;;  %p2587_p0 = scmp.lt.u32.totalorder %s2585_s23, %s2580_s25 }
  0xc9   : > { %p2583_p1 = pnand %p2582_p8, %p2581_p4  ;;  %p2589_p5 = scmp.lt.u32.totalorder %s2580_s25, %s2995_s9 }
  0xca   : > { %p2588_p2 = por %p2587_p0, %p2586_p13 }
  0xcb   : > { %p2584_p3 = pneg %p2583_p1 }
  0xcc   : > { %p2590_p9 = por %p2589_p5, %p2588_p2 }
  0xce   : > { %p2591_p10 = pnand %p2590_p9, %p2584_p3 }
  0xd0   : > { %2594 = shalt.err (!%p2591_p10)
}
  0xd1   : > { %s2595_s1 = scalar_lea.vmem %s2997_s14, 1280  ;;  %s2705_s15 = smov [#allocation2]  }
  0xd2   : > { %p2596_p4 = scmp.ne.s32.totalorder %s2997_s14, %s2595_s1  ;;  %s2600_s16 = sshll.u32 %s2705_s15, 4  ;;  %s2601_s16 = int_to_ptr.vmem [resolvable:$false] %s2600_s16 }
  0xd3   : > { %s2602_s19 = scalar_lea.vmem %s2601_s16, 2560  ;;  %p2603_p6 = scmp.lt.s32.totalorder %s2997_s14, %s2601_s16 }
  0xd4   : > { %p2598_p1 = pnand %p2596_p4, %p2582_p8  ;;  %p2604_p13 = scmp.lt.s32.totalorder %s2602_s19, %s2595_s1 }
  0xd6   : > { %p2599_p11 = pneg %p2598_p1  ;;  %p2605_p0 = por %p2604_p13, %p2603_p6 }
  0xd8   : > { %p2606_p2 = pnand %p2605_p0, %p2599_p11 }
  0xda   : > { %2609 = shalt.err (!%p2606_p2)
}
  0xdb   : > { %s2706_s25 = smov 640   ;;  %s2707_s18 = smov 40  }
  0xdc   : > { %2299 = dma.hbm_to_vmem [thread:$0]  (!%p2987_p12), %s2995_s9, 1280, %s2997_s14, %s2999_s20, %s2706_s25, %s2706_s25, %s2707_s18  }
  0xdd   : > { %p3163_p8 = scmp.ne.s32.totalorder %s3153_s12, 0 }
  0xde   : > { %s3030_s23 = sand.u32 (!%p3163_p8), 1, %s2684_s28  }
  0xdf   : > { %352 = sbr.rel (%p3163_p8) target bundleno = 1267 (0x4f3), region = 52  ;;  %s355_s26 = scalar_lea.sflag (!%p3163_p8), [#allocation3], %s3030_s23 }
  0xe0   : > { %s2241_s24 = smul.u32 (!%p3163_p8), 80, %s3030_s23 }
  0xe2   : > { %s3034_s1 = scalar_lea.vmem (!%p3163_p8), [#allocation2], %s2241_s24 }
  0xe6   : > { %2655 = dma.done.wait (%p2973_p7), %s355_s26, 1280  }
  0xe7   : > { %2657 = vsyncadd (%p2973_p7), %s355_s26, 4294966016  ;;  %p3164_p6 = scmp.eq.s32.totalorder %s2779_s11, 0 }
  0xe9   : > { %2659 = dma.done.wait (%p3164_p6), [#allocation6], 40976   ;;  %p3165_p11 = pmov %p3164_p6 }
  0xea   : > { %p3166_p12 = pmov %p3164_p6 }
  0xeb   : > { %2661 = vsyncadd (%p3165_p11), [#allocation6], 4294926320 }
  0xec   : > { %2663 = dma.done.wait (%p3166_p12), [#allocation9], 4128   ;;  %p3167_p3 = pmov %p3164_p6 }
  0xee   : > { %2665 = vsyncadd (%p3167_p3), [#allocation9], 4294963168  ;;  %p3168_p5 = pmov %p3167_p3 }
  0xef   : > { %p3169_p9 = pmov %p3167_p3 }
  0xf0   : > { %2667 = dma.done.wait (%p3168_p5), [#allocation12], 2064  }
  0xf1   : > { %2669 = vsyncadd (%p3169_p9), [#allocation12], 4294965232  ;;  %p3170_p7 = pmov %p3167_p3 }
  0xf2   : > { %p3171_p10 = pmov %p3167_p3 }
  0xf3   : > { %2671 = dma.done.wait (%p3170_p7), [#allocation15], 16  }
  0xf4   : > { %2673 = vsyncadd (%p3171_p10), [#allocation15], 4294967280  ;;  %v2708_v0 = vmov 0   ;;  %v2369_v1 = vld [vmem:[%s3034_s1 + $0x4] ss:$40 sps:$4 sm:$0xff]   ;;  %vm481_vm0 = vcmask 130048  }
  0xf5   : > { %517 = vmatprep.mubr.bf16.mxu0 %v2708_v0  ;;  %558 = vmatprep.mubr.bf16.mxu1 %v2708_v0  ;;  %v2371_v2 = vld [vmem:[%s3034_s1] ss:$40 sps:$4 sm:$0xff]   ;;  %v2372_v4 = vld [vmem:[%s3034_s1 + $0x10] ss:$40 sps:$4 sm:$0xff]   ;;  %v2374_v5 = vld [vmem:[%s3034_s1 + $0x14] ss:$40 sps:$4 sm:$0xff]  }
  0xf6   : > { %v3058_v3 = vld [vmem:[#allocation5] sm:$0x1]  ;;  %485 = vmatprep.subr.bf16.mxu0 %v2369_v1  ;;  %v2375_v6 = vld [vmem:[%s3034_s1 + $0xc] ss:$40 sps:$4 sm:$0xff]   ;;  %v2380_v8 = vld [vmem:[%s3034_s1 + $0x1c] ss:$40 sps:$4 sm:$0xff]  }
  0xf7   : > { %486 = vmatpush1.bf16.msra.mxu0 %v2371_v2  ;;  %v2377_v7 = vld [vmem:[%s3034_s1 + $0x8] ss:$40 sps:$4 sm:$0xff]   ;;  %526 = vmatprep.subr.bf16.mxu1 %v2375_v6  ;;  %v2378_v9 = vld [vmem:[%s3034_s1 + $0x18] ss:$40 sps:$4 sm:$0xff]   ;;  %v2383_v10 = vld [vmem:[%s3034_s1 + $0x24] ss:$40 sps:$4 sm:$0xff]  }
  0xf8   : > { %567 = vmatprep.subr.bf16.mxu0 %v2374_v5  ;;  %527 = vmatpush1.bf16.msra.mxu1 %v2377_v7  ;;  %v701_v11 = vld [vmem:[#allocation7 + $0x8] sm:$0xff]  ;;  %v703_v12 = vld [vmem:[#allocation7 + $0x18] sm:$0xff]  ;;  %v828_v17 = vld [vmem:[#allocation7 + $0x400] sm:$0xff]  ;;  %vm2710_vm1 = vmmov 0   ;;  %s1763_s12 = sshll.u32 %s2779_s11, 4  ;;  %s417_s10 = scalar_lea.vmem [#allocation16], %s3030_s23 }
  0xf9   : > { %608 = vmatprep.subr.bf16.mxu1 %v2380_v8  ;;  %v829_v13 = vld [vmem:[#allocation7 + $0x408] sm:$0xff]  ;;  %v831_v14 = vld [vmem:[#allocation7 + $0x418] sm:$0xff]  ;;  %v1853_v18 = vpack.c.bf16 %v703_v12, %v701_v11  ;;  %v830_v19 = vld [vmem:[#allocation7 + $0x410] sm:$0xff]  ;;  %s1594_s21 = sshll.u32 %s417_s10, 4  ;;  %s3095_s20 = scalar_lea.hbm %s3147_s8, %s1763_s12  ;;  %s3097_s21 = int_to_ptr.vmem [resolvable:$true] %s1594_s21 }
  0xfa   : > { %1758 = vmatmul.mubr.msk.bf16.vlgmr.msra.gmra.mrb[0].mxu0 %vm481_vm0, %v3058_v3  ;;  %v2381_v15 = vld [vmem:[%s3034_s1 + $0x20] ss:$40 sps:$4 sm:$0xff]   ;;  %v1981_v16 = vpack.c.bf16 %v831_v14, %v829_v13  ;;  %v1983_v22 = vpack.c.bf16 %v830_v19, %v828_v17  ;;  %s1582_s15 = scalar_lea.sflag [#allocation4], %s3030_s23  ;;  %s2610_s16 = scalar_lea.vmem %s3097_s21, 16 }
  0xfb   : > { %568 = vmatpush1.bf16.msra.mxu0 %v2372_v4  ;;  %599 = vmatprep.mubr.bf16.mxu0 %v2708_v0  ;;  %v833_v20 = vld [vmem:[#allocation7 + $0x428] sm:$0xff]  ;;  %v835_v21 = vld [vmem:[#allocation7 + $0x438] sm:$0xff]  ;;  %v700_v23 = vld [vmem:[#allocation7] sm:$0xff]  ;;  %p2611_p4 = scmp.ne.s32.totalorder %s3097_s21, %s2610_s16  ;;  %p3172_p1 = scmp.ne.s32.totalorder %s3160_s22, 0 }
  0xfc   : > { %649 = vmatprep.subr.bf16.mxu0 %v2383_v10  ;;  %1759 = vmatmul.mubr.msk.bf16.vlgmr.msra.gmra.mrb[0].mxu1 %vm481_vm0, %v3058_v3  ;;  %v1985_v24 = vpack.c.bf16 %v835_v21, %v833_v20  ;;  %v832_v25 = vld [vmem:[#allocation7 + $0x420] sm:$0xff]  ;;  %v834_v26 = vld [vmem:[#allocation7 + $0x430] sm:$0xff]  ;;  %v837_v28 = vld [vmem:[#allocation7 + $0x448] sm:$0xff]  ;;  %s2712_s11 = smov [#allocation16]  }
  0xfd   : > { %609 = vmatpush1.bf16.msra.mxu1 %v2378_v9  ;;  %640 = vmatprep.mubr.bf16.mxu1 %v2708_v0  ;;  %v702_v27 = vld [vmem:[#allocation7 + $0x10] sm:$0xff]  ;;  %v839_v29 = vld [vmem:[#allocation7 + $0x458] sm:$0xff]  ;;  %v705_v30 = vld [vmem:[#allocation7 + $0x28] sm:$0xff]  ;;  %v1987_v32 = vpack.c.bf16 %v834_v26, %v832_v25  ;;  %p2612_p13 = pnand %p2611_p4, %p3172_p1  ;;  %s2614_s19 = sshll.u32 %s2712_s11, 4  ;;  %s2615_s19 = int_to_ptr.vmem [resolvable:$false] %s2614_s19 }
  0xfe   : > { %1982 = vmatprep.subr.bf16.mxu1 %v1981_v16  ;;  %v707_v31 = vld [vmem:[#allocation7 + $0x38] sm:$0xff]  ;;  %v1855_v33 = vpack.c.bf16 %v702_v27, %v700_v23  ;;  %v704_v34 = vld [vmem:[#allocation7 + $0x20] sm:$0xff]  ;;  %v1989_v35 = vpack.c.bf16 %v839_v29, %v837_v28  ;;  %v838_v37 = vld [vmem:[#allocation7 + $0x450] sm:$0xff]  ;;  %s2616_s25 = scalar_lea.vmem %s2615_s19, 32  ;;  %p2617_p2 = scmp.lt.s32.totalorder %s3097_s21, %s2615_s19 }
  0xff   : > { %v836_v36 = vld [vmem:[#allocation7 + $0x440] sm:$0xff]  ;;  %v1857_v38 = vpack.c.bf16 %v707_v31, %v705_v30  ;;  %v706_v39 = vld [vmem:[#allocation7 + $0x30] sm:$0xff]  ;;  %v841_v40 = vld [vmem:[#allocation7 + $0x468] sm:$0xff]  ;;  %p2613_p0 = pneg %p2612_p13  ;;  %p2618_p8 = scmp.lt.s32.totalorder %s2616_s25, %s2610_s16 }
 0x100   : > { %v843_v41 = vld [vmem:[#allocation7 + $0x478] sm:$0xff]  ;;  %v709_v42 = vld [vmem:[#allocation7 + $0x48] sm:$0xff]  ;;  %v1991_v44 = vpack.c.bf16 %v838_v37, %v836_v36  ;;  %v1859_v45 = vpack.c.bf16 %v706_v39, %v704_v34  ;;  %v708_v46 = vld [vmem:[#allocation7 + $0x40] sm:$0xff] }
 0x101   : > { %v711_v43 = vld [vmem:[#allocation7 + $0x58] sm:$0xff]  ;;  %v1993_v47 = vpack.c.bf16 %v843_v41, %v841_v40  ;;  %v840_v48 = vld [vmem:[#allocation7 + $0x460] sm:$0xff]  ;;  %v842_v49 = vld [vmem:[#allocation7 + $0x470] sm:$0xff]  ;;  %p2619_p6 = por %p2618_p8, %p2617_p2 }
 0x102   : > { %1760 = vmatmul.mubr.msk.bf16.vlgmr.msra.gmra.mrb[4].mxu0 %vm481_vm0, %v3058_v3  ;;  %v1861_v50 = vpack.c.bf16 %v711_v43, %v709_v42  ;;  %v710_v51 = vld [vmem:[#allocation7 + $0x50] sm:$0xff]  ;;  %v845_v52 = vld [vmem:[#allocation7 + $0x488] sm:$0xff]  ;;  %v847_v53 = vld [vmem:[#allocation7 + $0x498] sm:$0xff]  ;;  %v1995_v56 = vpack.c.bf16 %v842_v49, %v840_v48 }
 0x103   : > { %650 = vmatpush1.bf16.msra.mxu0 %v2381_v15  ;;  %681 = vmatprep.mubr.bf16.mxu0 %v2708_v0  ;;  %v713_v54 = vld [vmem:[#allocation7 + $0x68] sm:$0xff]  ;;  %v715_v55 = vld [vmem:[#allocation7 + $0x78] sm:$0xff]  ;;  %v1863_v57 = vpack.c.bf16 %v710_v51, %v708_v46  ;;  %v712_v58 = vld [vmem:[#allocation7 + $0x60] sm:$0xff]  ;;  %v1997_v59 = vpack.c.bf16 %v847_v53, %v845_v52  ;;  %p2620_p11 = pnand %p2619_p6, %p2613_p0 }
 0x104   : > { %1854 = vmatprep.subr.bf16.mxu0 %v1853_v18  ;;  %1761 = vmatmul.mubr.msk.bf16.vlgmr.msra.gmra.mrb[4].mxu1 %vm481_vm0, %v3058_v3  ;;  %v844_v60 = vld [vmem:[#allocation7 + $0x480] sm:$0xff]  ;;  %v846_v61 = vld [vmem:[#allocation7 + $0x490] sm:$0xff]  ;;  %v1865_v62 = vpack.c.bf16 %v715_v55, %v713_v54  ;;  %v849_v0 = vld [vmem:[#allocation7 + $0x4a8] sm:$0xff] }
 0x105   : > { %1984 = vmatpush1.bf16.msra.mxu1 %v1983_v22  ;;  %v714_v63 = vld [vmem:[#allocation7 + $0x70] sm:$0xff]  ;;  %v851_v1 = vld [vmem:[#allocation7 + $0x4b8] sm:$0xff]  ;;  %v717_v2 = vld [vmem:[#allocation7 + $0x88] sm:$0xff]  ;;  %v1999_v4 = vpack.c.bf16 %v846_v61, %v844_v60 }
 0x106   : > { %1986 = vmatprep.subr.bf16.mxu1 %v1985_v24  ;;  %v1867_v5 = vpack.c.bf16 %v714_v63, %v712_v58  ;;  %v716_v6 = vld [vmem:[#allocation7 + $0x80] sm:$0xff]  ;;  %v2001_v7 = vpack.c.bf16 %v851_v1, %v849_v0  ;;  %v850_v9 = vld [vmem:[#allocation7 + $0x4b0] sm:$0xff]  ;;  %v853_v12 = vld [vmem:[#allocation7 + $0x4c8] sm:$0xff] }
 0x107   : > { %v848_v8 = vld [vmem:[#allocation7 + $0x4a0] sm:$0xff]  ;;  %v718_v11 = vld [vmem:[#allocation7 + $0x90] sm:$0xff]  ;;  %v855_v13 = vld [vmem:[#allocation7 + $0x4d8] sm:$0xff] }
 0x108   : > { %v721_v14 = vld [vmem:[#allocation7 + $0xa8] sm:$0xff]  ;;  %v723_v15 = vld [vmem:[#allocation7 + $0xb8] sm:$0xff]  ;;  %v2003_v16 = vpack.c.bf16 %v850_v9, %v848_v8  ;;  %v1871_v17 = vpack.c.bf16 %v718_v11, %v716_v6  ;;  %v720_v18 = vld [vmem:[#allocation7 + $0xa0] sm:$0xff]  ;;  %v2005_v19 = vpack.c.bf16 %v855_v13, %v853_v12 }
 0x109   : > { %1988 = vmatpush1.bf16.msra.mxu1 %v1987_v32  ;;  %v852_v20 = vld [vmem:[#allocation7 + $0x4c0] sm:$0xff]  ;;  %v854_v21 = vld [vmem:[#allocation7 + $0x4d0] sm:$0xff]  ;;  %v1873_v22 = vpack.c.bf16 %v723_v15, %v721_v14  ;;  %v857_v24 = vld [vmem:[#allocation7 + $0x4e8] sm:$0xff] }
 0x10a   : > { %1762 = vmatmul.mubr.msk.bf16.vlgmr.msra.gmra.mrb[8].mxu0 %vm481_vm0, %v3058_v3  ;;  %1990 = vmatprep.subr.bf16.mxu1 %v1989_v35  ;;  %v719_v3 = vld [vmem:[#allocation7 + $0x98] sm:$0xff]  ;;  %v722_v23 = vld [vmem:[#allocation7 + $0xb0] sm:$0xff]  ;;  %v725_v26 = vld [vmem:[#allocation7 + $0xc8] sm:$0xff]  ;;  %v2007_v28 = vpack.c.bf16 %v854_v21, %v852_v20 }
 0x10b   : > { %1856 = vmatpush1.bf16.msra.mxu0 %v1855_v33  ;;  %v1869_v10 = vpack.c.bf16 %v719_v3, %v717_v2  ;;  %v859_v25 = vld [vmem:[#allocation7 + $0x4f8] sm:$0xff]  ;;  %v1875_v29 = vpack.c.bf16 %v722_v23, %v720_v18  ;;  %v724_v30 = vld [vmem:[#allocation7 + $0xc0] sm:$0xff]  ;;  %v858_v33 = vld [vmem:[#allocation7 + $0x4f0] sm:$0xff] }
 0x10c   : > { %1858 = vmatprep.subr.bf16.mxu0 %v1857_v38  ;;  %v727_v27 = vld [vmem:[#allocation7 + $0xd8] sm:$0xff]  ;;  %v2009_v31 = vpack.c.bf16 %v859_v25, %v857_v24  ;;  %v856_v32 = vld [vmem:[#allocation7 + $0x4e0] sm:$0xff]  ;;  %v726_v35 = vld [vmem:[#allocation7 + $0xd0] sm:$0xff] }
 0x10d   : > { %1992 = vmatpush1.bf16.msra.mxu1 %v1991_v44  ;;  %v1877_v34 = vpack.c.bf16 %v727_v27, %v725_v26  ;;  %v861_v36 = vld [vmem:[#allocation7 + $0x508] sm:$0xff]  ;;  %v863_v37 = vld [vmem:[#allocation7 + $0x518] sm:$0xff]  ;;  %v2011_v40 = vpack.c.bf16 %v858_v33, %v856_v32  ;;  %v1879_v41 = vpack.c.bf16 %v726_v35, %v724_v30  ;;  %v728_v42 = vld [vmem:[#allocation7 + $0xe0] sm:$0xff] }
 0x10e   : > { %1994 = vmatprep.subr.bf16.mxu1 %v1993_v47  ;;  %v729_v38 = vld [vmem:[#allocation7 + $0xe8] sm:$0xff]  ;;  %v731_v39 = vld [vmem:[#allocation7 + $0xf8] sm:$0xff]  ;;  %v2013_v43 = vpack.c.bf16 %v863_v37, %v861_v36  ;;  %v860_v44 = vld [vmem:[#allocation7 + $0x500] sm:$0xff] }
 0x10f   : > { %1860 = vmatpush1.bf16.msra.mxu0 %v1859_v45  ;;  %v862_v45 = vld [vmem:[#allocation7 + $0x510] sm:$0xff]  ;;  %v1881_v46 = vpack.c.bf16 %v731_v39, %v729_v38  ;;  %v865_v48 = vld [vmem:[#allocation7 + $0x528] sm:$0xff]  ;;  %v867_v49 = vld [vmem:[#allocation7 + $0x538] sm:$0xff] }
 0x110   : > { %1862 = vmatprep.subr.bf16.mxu0 %v1861_v50  ;;  %v730_v47 = vld [vmem:[#allocation7 + $0xf0] sm:$0xff]  ;;  %v733_v50 = vld [vmem:[#allocation7 + $0x108] sm:$0xff]  ;;  %v735_v51 = vld [vmem:[#allocation7 + $0x118] sm:$0xff]  ;;  %v2015_v52 = vpack.c.bf16 %v862_v45, %v860_v44  ;;  %v2017_v55 = vpack.c.bf16 %v867_v49, %v865_v48 }
 0x111   : > { %1996 = vmatpush1.bf16.msra.mxu1 %v1995_v56  ;;  %v1883_v53 = vpack.c.bf16 %v730_v47, %v728_v42  ;;  %v732_v54 = vld [vmem:[#allocation7 + $0x100] sm:$0xff]  ;;  %v1885_v58 = vpack.c.bf16 %v735_v51, %v733_v50  ;;  %v869_v60 = vld [vmem:[#allocation7 + $0x548] sm:$0xff]  ;;  %v871_v61 = vld [vmem:[#allocation7 + $0x558] sm:$0xff] }
 0x112   : > { %1998 = vmatprep.subr.bf16.mxu1 %v1997_v59  ;;  %v864_v56 = vld [vmem:[#allocation7 + $0x520] sm:$0xff]  ;;  %v734_v59 = vld [vmem:[#allocation7 + $0x110] sm:$0xff]  ;;  %v739_v63 = vld [vmem:[#allocation7 + $0x138] sm:$0xff]  ;;  %v2021_v3 = vpack.c.bf16 %v871_v61, %v869_v60 }
 0x113   : > { %1864 = vmatpush1.bf16.msra.mxu0 %v1863_v57  ;;  %v866_v57 = vld [vmem:[#allocation7 + $0x530] sm:$0xff]  ;;  %v1887_v1 = vpack.c.bf16 %v734_v59, %v732_v54  ;;  %v736_v2 = vld [vmem:[#allocation7 + $0x120] sm:$0xff]  ;;  %v873_v8 = vld [vmem:[#allocation7 + $0x568] sm:$0xff] }
 0x114   : > { %1866 = vmatprep.subr.bf16.mxu0 %v1865_v62  ;;  %v737_v62 = vld [vmem:[#allocation7 + $0x128] sm:$0xff]  ;;  %v2019_v0 = vpack.c.bf16 %v866_v57, %v864_v56  ;;  %v875_v9 = vld [vmem:[#allocation7 + $0x578] sm:$0xff]  ;;  %v740_v14 = vld [vmem:[#allocation7 + $0x140] sm:$0xff] }
 0x115   : > { %2000 = vmatpush1.bf16.msra.mxu1 %v1999_v4  ;;  %v868_v4 = vld [vmem:[#allocation7 + $0x540] sm:$0xff]  ;;  %v1889_v6 = vpack.c.bf16 %v739_v63, %v737_v62  ;;  %v743_v11 = vld [vmem:[#allocation7 + $0x158] sm:$0xff]  ;;  %v2025_v15 = vpack.c.bf16 %v875_v9, %v873_v8  ;;  %v877_v20 = vld [vmem:[#allocation7 + $0x588] sm:$0xff] }
 0x116   : > { %2002 = vmatprep.subr.bf16.mxu1 %v2001_v7  ;;  %v738_v7 = vld [vmem:[#allocation7 + $0x130] sm:$0xff]  ;;  %v879_v21 = vld [vmem:[#allocation7 + $0x598] sm:$0xff]  ;;  %v876_v27 = vld [vmem:[#allocation7 + $0x580] sm:$0xff] }
 0x117   : > { %1868 = vmatpush1.bf16.msra.mxu0 %v1867_v5  ;;  %v870_v5 = vld [vmem:[#allocation7 + $0x550] sm:$0xff]  ;;  %v1891_v13 = vpack.c.bf16 %v738_v7, %v736_v2  ;;  %v747_v23 = vld [vmem:[#allocation7 + $0x178] sm:$0xff]  ;;  %v2029_v26 = vpack.c.bf16 %v879_v21, %v877_v20  ;;  %v744_v30 = vld [vmem:[#allocation7 + $0x160] sm:$0xff] }
 0x118   : > { %1870 = vmatprep.subr.bf16.mxu0 %v1869_v10  ;;  %v741_v10 = vld [vmem:[#allocation7 + $0x148] sm:$0xff]  ;;  %v2023_v12 = vpack.c.bf16 %v870_v5, %v868_v4  ;;  %v751_v33 = vld [vmem:[#allocation7 + $0x198] sm:$0xff]  ;;  %v748_v37 = vld [vmem:[#allocation7 + $0x180] sm:$0xff] }
 0x119   : > { %2004 = vmatpush1.bf16.msra.mxu1 %v2003_v16  ;;  %v872_v16 = vld [vmem:[#allocation7 + $0x560] sm:$0xff]  ;;  %v1893_v18 = vpack.c.bf16 %v743_v11, %v741_v10  ;;  %v749_v32 = vld [vmem:[#allocation7 + $0x188] sm:$0xff]  ;;  %v750_v38 = vld [vmem:[#allocation7 + $0x190] sm:$0xff] }
 0x11a   : > { %2006 = vmatprep.subr.bf16.mxu1 %v2005_v19  ;;  %v742_v19 = vld [vmem:[#allocation7 + $0x150] sm:$0xff]  ;;  %v1901_v36 = vpack.c.bf16 %v751_v33, %v749_v32  ;;  %v753_v39 = vld [vmem:[#allocation7 + $0x1a8] sm:$0xff]  ;;  %v756_v49 = vld [vmem:[#allocation7 + $0x1c0] sm:$0xff] }
 0x11b   : > { %1872 = vmatpush1.bf16.msra.mxu0 %v1871_v17  ;;  %v874_v17 = vld [vmem:[#allocation7 + $0x570] sm:$0xff]  ;;  %v1895_v25 = vpack.c.bf16 %v742_v19, %v740_v14  ;;  %v757_v45 = vld [vmem:[#allocation7 + $0x1c8] sm:$0xff]  ;;  %v883_v56 = vld [vmem:[#allocation7 + $0x5b8] sm:$0xff] }
 0x11c   : > { %1874 = vmatprep.subr.bf16.mxu0 %v1873_v22  ;;  %v745_v22 = vld [vmem:[#allocation7 + $0x168] sm:$0xff]  ;;  %v2027_v24 = vpack.c.bf16 %v874_v17, %v872_v16  ;;  %v754_v44 = vld [vmem:[#allocation7 + $0x1b0] sm:$0xff]  ;;  %v760_v57 = vld [vmem:[#allocation7 + $0x1e0] sm:$0xff] }
 0x11d   : > { %2008 = vmatpush1.bf16.msra.mxu1 %v2007_v28  ;;  %v878_v28 = vld [vmem:[#allocation7 + $0x590] sm:$0xff]  ;;  %v881_v54 = vld [vmem:[#allocation7 + $0x5a8] sm:$0xff]  ;;  %v880_v61 = vld [vmem:[#allocation7 + $0x5a0] sm:$0xff] }
 0x11e   : > { %2010 = vmatprep.subr.bf16.mxu1 %v2009_v31  ;;  %v746_v31 = vld [vmem:[#allocation7 + $0x170] sm:$0xff]  ;;  %v2033_v59 = vpack.c.bf16 %v883_v56, %v881_v54  ;;  %v885_v2 = vld [vmem:[#allocation7 + $0x5c8] sm:$0xff]  ;;  %v887_v4 = vld [vmem:[#allocation7 + $0x5d8] sm:$0xff] }
 0x11f   : > { %1876 = vmatpush1.bf16.msra.mxu0 %v1875_v29  ;;  %v1897_v29 = vpack.c.bf16 %v747_v23, %v745_v22  ;;  %v1899_v35 = vpack.c.bf16 %v746_v31, %v744_v30  ;;  %v758_v50 = vld [vmem:[#allocation7 + $0x1d0] sm:$0xff]  ;;  %v2037_v5 = vpack.c.bf16 %v887_v4, %v885_v2  ;;  %v889_v9 = vld [vmem:[#allocation7 + $0x5e8] sm:$0xff]  ;;  %v891_v10 = vld [vmem:[#allocation7 + $0x5f8] sm:$0xff] }
 0x120   : > { %1878 = vmatprep.subr.bf16.mxu0 %v1877_v34  ;;  %v2031_v34 = vpack.c.bf16 %v878_v28, %v876_v27  ;;  %v1911_v51 = vpack.c.bf16 %v758_v50, %v756_v49  ;;  %v882_v62 = vld [vmem:[#allocation7 + $0x5b0] sm:$0xff]  ;;  %v2041_v11 = vpack.c.bf16 %v891_v10, %v889_v9  ;;  %v895_v16 = vld [vmem:[#allocation7 + $0x618] sm:$0xff]  ;;  %v769_v21 = vld [vmem:[#allocation7 + $0x228] sm:$0xff] }
 0x121   : > { %2012 = vmatpush1.bf16.msra.mxu1 %v2011_v40  ;;  %v755_v40 = vld [vmem:[#allocation7 + $0x1b8] sm:$0xff]  ;;  %v2035_v63 = vpack.c.bf16 %v882_v62, %v880_v61  ;;  %v886_v7 = vld [vmem:[#allocation7 + $0x5d0] sm:$0xff]  ;;  %v768_v30 = vld [vmem:[#allocation7 + $0x220] sm:$0xff] }
 0x122   : > { %2014 = vmatprep.subr.bf16.mxu1 %v2013_v43  ;;  %v1905_v42 = vpack.c.bf16 %v755_v40, %v753_v39  ;;  %v752_v43 = vld [vmem:[#allocation7 + $0x1a0] sm:$0xff]  ;;  %v766_v19 = vld [vmem:[#allocation7 + $0x210] sm:$0xff]  ;;  %v771_v22 = vld [vmem:[#allocation7 + $0x238] sm:$0xff] }
 0x123   : > { %1880 = vmatpush1.bf16.msra.mxu0 %v1879_v41  ;;  %v1903_v41 = vpack.c.bf16 %v750_v38, %v748_v37  ;;  %v1907_v47 = vpack.c.bf16 %v754_v44, %v752_v43  ;;  %v770_v31 = vld [vmem:[#allocation7 + $0x230] sm:$0xff]  ;;  %v773_v33 = vld [vmem:[#allocation7 + $0x248] sm:$0xff]  ;;  %v772_v39 = vld [vmem:[#allocation7 + $0x240] sm:$0xff] }
 0x124   : > { %1882 = vmatprep.subr.bf16.mxu0 %v1881_v46  ;;  %v759_v46 = vld [vmem:[#allocation7 + $0x1d8] sm:$0xff]  ;;  %v1923_v38 = vpack.c.bf16 %v770_v31, %v768_v30  ;;  %v774_v40 = vld [vmem:[#allocation7 + $0x250] sm:$0xff]  ;;  %v892_v43 = vld [vmem:[#allocation7 + $0x600] sm:$0xff] }
 0x125   : > { %2016 = vmatpush1.bf16.msra.mxu1 %v2015_v52  ;;  %v1909_v48 = vpack.c.bf16 %v759_v46, %v757_v45  ;;  %v761_v52 = vld [vmem:[#allocation7 + $0x1e8] sm:$0xff]  ;;  %v894_v44 = vld [vmem:[#allocation7 + $0x610] sm:$0xff]  ;;  %v899_v49 = vld [vmem:[#allocation7 + $0x638] sm:$0xff] }
 0x126   : > { %2018 = vmatprep.subr.bf16.mxu1 %v2017_v55  ;;  %v777_v45 = vld [vmem:[#allocation7 + $0x268] sm:$0xff]  ;;  %v2047_v54 = vpack.c.bf16 %v894_v44, %v892_v43  ;;  %v778_v56 = vld [vmem:[#allocation7 + $0x270] sm:$0xff]  ;;  %v896_v61 = vld [vmem:[#allocation7 + $0x620] sm:$0xff] }
 0x127   : > { %1884 = vmatpush1.bf16.msra.mxu0 %v1883_v53  ;;  %v763_v53 = vld [vmem:[#allocation7 + $0x1f8] sm:$0xff]  ;;  %v898_v62 = vld [vmem:[#allocation7 + $0x630] sm:$0xff]  ;;  %v901_v2 = vld [vmem:[#allocation7 + $0x648] sm:$0xff] }
 0x128   : > { %1886 = vmatprep.subr.bf16.mxu0 %v1885_v58  ;;  %v1913_v55 = vpack.c.bf16 %v763_v53, %v761_v52  ;;  %v762_v58 = vld [vmem:[#allocation7 + $0x1f0] sm:$0xff]  ;;  %v1927_v53 = vpack.c.bf16 %v774_v40, %v772_v39  ;;  %v780_v9 = vld [vmem:[#allocation7 + $0x280] sm:$0xff]  ;;  %v789_v31 = vld [vmem:[#allocation7 + $0x2c8] sm:$0xff] }
 0x129   : > { %2020 = vmatpush1.bf16.msra.mxu1 %v2019_v0  ;;  %v1915_v60 = vpack.c.bf16 %v762_v58, %v760_v57  ;;  %v765_v0 = vld [vmem:[#allocation7 + $0x208] sm:$0xff]  ;;  %v782_v10 = vld [vmem:[#allocation7 + $0x290] sm:$0xff]  ;;  %v788_v39 = vld [vmem:[#allocation7 + $0x2c0] sm:$0xff] }
 0x12a   : > { %2022 = vmatprep.subr.bf16.mxu1 %v2021_v3  ;;  %v906_v30 = vld [vmem:[#allocation7 + $0x670] sm:$0xff]  ;;  %v908_v43 = vld [vmem:[#allocation7 + $0x680] sm:$0xff] }
 0x12b   : > { %1888 = vmatpush1.bf16.msra.mxu0 %v1887_v1  ;;  %v767_v1 = vld [vmem:[#allocation7 + $0x218] sm:$0xff]  ;;  %v790_v40 = vld [vmem:[#allocation7 + $0x2d0] sm:$0xff] }
 0x12c   : > { %1890 = vmatprep.subr.bf16.mxu0 %v1889_v6  ;;  %v1917_v3 = vpack.c.bf16 %v767_v1, %v765_v0  ;;  %v884_v6 = vld [vmem:[#allocation7 + $0x5c0] sm:$0xff]  ;;  %v783_v1 = vld [vmem:[#allocation7 + $0x298] sm:$0xff]  ;;  %v910_v44 = vld [vmem:[#allocation7 + $0x690] sm:$0xff] }
 0x12d   : > { %2024 = vmatpush1.bf16.msra.mxu1 %v2023_v12  ;;  %v2039_v8 = vpack.c.bf16 %v886_v7, %v884_v6  ;;  %v888_v12 = vld [vmem:[#allocation7 + $0x5e0] sm:$0xff] }
 0x12e   : > { %2026 = vmatprep.subr.bf16.mxu1 %v2025_v15  ;;  %v893_v15 = vld [vmem:[#allocation7 + $0x608] sm:$0xff] }
 0x12f   : > { %1892 = vmatpush1.bf16.msra.mxu0 %v1891_v13  ;;  %v890_v13 = vld [vmem:[#allocation7 + $0x5f0] sm:$0xff]  ;;  %v2045_v17 = vpack.c.bf16 %v895_v16, %v893_v15  ;;  %v785_v16 = vld [vmem:[#allocation7 + $0x2a8] sm:$0xff] }
 0x130   : > { %1894 = vmatprep.subr.bf16.mxu0 %v1893_v18  ;;  %v2043_v14 = vpack.c.bf16 %v890_v13, %v888_v12  ;;  %v764_v18 = vld [vmem:[#allocation7 + $0x200] sm:$0xff]  ;;  %v902_v15 = vld [vmem:[#allocation7 + $0x650] sm:$0xff] }
 0x131   : > { %2028 = vmatpush1.bf16.msra.mxu1 %v2027_v24 }
 0x132   : > { %2030 = vmatprep.subr.bf16.mxu1 %v2029_v26  ;;  %v1919_v26 = vpack.c.bf16 %v766_v19, %v764_v18  ;;  %v905_v18 = vld [vmem:[#allocation7 + $0x668] sm:$0xff]  ;;  %v907_v19 = vld [vmem:[#allocation7 + $0x678] sm:$0xff] }
 0x133   : > { %1896 = vmatpush1.bf16.msra.mxu0 %v1895_v25 }
 0x134   : > { %1898 = vmatprep.subr.bf16.mxu0 %v1897_v29  ;;  %v1921_v29 = vpack.c.bf16 %v771_v22, %v769_v21  ;;  %v1935_v22 = vpack.c.bf16 %v782_v10, %v780_v9  ;;  %v923_v9 = vld [vmem:[#allocation7 + $0x6f8] sm:$0xff] }
 0x135   : > { %2032 = vmatpush1.bf16.msra.mxu1 %v2031_v34  ;;  %v775_v34 = vld [vmem:[#allocation7 + $0x258] sm:$0xff] }
 0x136   : > { %2034 = vmatprep.subr.bf16.mxu1 %v2033_v59 }
 0x137   : > { %1900 = vmatpush1.bf16.msra.mxu0 %v1899_v35 }
 0x138   : > { %1902 = vmatprep.subr.bf16.mxu0 %v1901_v36 }
 0x139   : > { %2036 = vmatpush1.bf16.msra.mxu1 %v2035_v63  ;;  %v781_v63 = vld [vmem:[#allocation7 + $0x288] sm:$0xff] }
 0x13a   : > { %2038 = vmatprep.subr.bf16.mxu1 %v2037_v5  ;;  %v1933_v12 = vpack.c.bf16 %v783_v1, %v781_v63  ;;  %v796_v63 = vld [vmem:[#allocation7 + $0x300] sm:$0xff]  ;;  %v798_v1 = vld [vmem:[#allocation7 + $0x310] sm:$0xff] }
 0x13b   : > { %1904 = vmatpush1.bf16.msra.mxu0 %v1903_v41  ;;  %v1951_v10 = vpack.c.bf16 %v798_v1, %v796_v63  ;;  %v816_v63 = vld [vmem:[#allocation7 + $0x3a0] sm:$0xff]  ;;  %v818_v1 = vld [vmem:[#allocation7 + $0x3b0] sm:$0xff] }
 0x13c   : > { %1906 = vmatprep.subr.bf16.mxu0 %v1905_v42  ;;  %v1925_v42 = vpack.c.bf16 %v775_v34, %v773_v33  ;;  %v791_v34 = vld [vmem:[#allocation7 + $0x2d8] sm:$0xff] }
 0x13d   : > { %2040 = vmatpush1.bf16.msra.mxu1 %v2039_v8  ;;  %v2051_v8 = vpack.c.bf16 %v898_v62, %v896_v61 }
 0x13e   : > { %2042 = vmatprep.subr.bf16.mxu1 %v2041_v11 }
 0x13f   : > { %1908 = vmatpush1.bf16.msra.mxu0 %v1907_v47  ;;  %v779_v47 = vld [vmem:[#allocation7 + $0x278] sm:$0xff] }
 0x140   : > { %1910 = vmatprep.subr.bf16.mxu0 %v1909_v48  ;;  %v897_v48 = vld [vmem:[#allocation7 + $0x628] sm:$0xff]  ;;  %v1929_v59 = vpack.c.bf16 %v779_v47, %v777_v45 }
 0x141   : > { %2044 = vmatpush1.bf16.msra.mxu1 %v2043_v14  ;;  %v900_v14 = vld [vmem:[#allocation7 + $0x640] sm:$0xff]  ;;  %v793_v45 = vld [vmem:[#allocation7 + $0x2e8] sm:$0xff] }
 0x142   : > { %2046 = vmatprep.subr.bf16.mxu1 %v2045_v17  ;;  %v787_v17 = vld [vmem:[#allocation7 + $0x2b8] sm:$0xff]  ;;  %v913_v47 = vld [vmem:[#allocation7 + $0x6a8] sm:$0xff] }
 0x143   : > { %1912 = vmatpush1.bf16.msra.mxu0 %v1911_v51 }
 0x144   : > { %1914 = vmatprep.subr.bf16.mxu0 %v1913_v55  ;;  %v776_v55 = vld [vmem:[#allocation7 + $0x260] sm:$0xff] }
 0x145   : > { %v1931_v7 = vpack.c.bf16 %v778_v56, %v776_v55  ;;  %v912_v55 = vld [vmem:[#allocation7 + $0x6a0] sm:$0xff]  ;;  %v914_v56 = vld [vmem:[#allocation7 + $0x6b0] sm:$0xff] }
 0x146   : > { %v2067_v62 = vpack.c.bf16 %v914_v56, %v912_v55  ;;  %v932_v55 = vld [vmem:[#allocation7 + $0x740] sm:$0xff]  ;;  %v934_v56 = vld [vmem:[#allocation7 + $0x750] sm:$0xff] }
 0x147   : > { %1916 = vmatpush1.bf16.msra.mxu0 %v1915_v60  ;;  %v2049_v60 = vpack.c.bf16 %v899_v49, %v897_v48  ;;  %v915_v48 = vld [vmem:[#allocation7 + $0x6b8] sm:$0xff]  ;;  %v1943_v49 = vpack.c.bf16 %v790_v40, %v788_v39  ;;  %v808_v39 = vld [vmem:[#allocation7 + $0x360] sm:$0xff]  ;;  %v810_v40 = vld [vmem:[#allocation7 + $0x370] sm:$0xff] }
 0x148   : > { %1918 = vmatprep.subr.bf16.mxu0 %v1917_v3  ;;  %v903_v3 = vld [vmem:[#allocation7 + $0x658] sm:$0xff] }
 0x149   : > { %v2053_v13 = vpack.c.bf16 %v903_v3, %v901_v2 }
 0x1cd   : > { %v519_v20 = vpop.f32.mrb[0].mxu0 }
 0x1ce   : > { %v521_v23 = vpop.f32.mrb[1].mxu0  ;;  %v690_v27 = vmul.f32 0.0625, %v519_v20 }
 0x1cf   : > { %v691_v24 = vmul.f32 0.0625, %v521_v23  ;;  %v523_v25 = vpop.f32.mrb[2].mxu0  ;;  %v3078_v32 = vpop.f32.mrb[0].mxu1  ;;  %v2055_v23 = vpack.c.bf16 %v902_v15, %v900_v14 }
 0x1d0   : > { %v524_v28 = vpop.f32.mrb[3].mxu0  ;;  %v562_v35 = vpop.f32.mrb[1].mxu1  ;;  %v786_v25 = vld [vmem:[#allocation7 + $0x2b0] sm:$0xff] }
 0x1d1   : > { %1096 = vmatprep.mubr.f32.mxu0 %v691_v24  ;;  %v693_v36 = vmul.f32 0.0625, %v562_v35  ;;  %v564_v37 = vpop.f32.mrb[2].mxu1  ;;  %v784_v24 = vld [vmem:[#allocation7 + $0x2a0] sm:$0xff]  ;;  %v2057_v28 = vpack.c.bf16 %v907_v19, %v905_v18  ;;  %v909_v35 = vld [vmem:[#allocation7 + $0x688] sm:$0xff]  ;;  %v807_v19 = vld [vmem:[#allocation7 + $0x358] sm:$0xff] }
 0x1d2   : > { %1097 = vmatmul.mubr.f32.vlgmr.msra.gmra.mrb[12].mxu0 %v690_v27  ;;  %v565_v41 = vpop.f32.mrb[3].mxu1  ;;  %v1937_v27 = vpack.c.bf16 %v787_v17, %v785_v16  ;;  %v1939_v37 = vpack.c.bf16 %v786_v25, %v784_v24  ;;  %v920_v16 = vld [vmem:[#allocation7 + $0x6e0] sm:$0xff]  ;;  %v922_v17 = vld [vmem:[#allocation7 + $0x6f0] sm:$0xff]  ;;  %v805_v18 = vld [vmem:[#allocation7 + $0x348] sm:$0xff] }
 0x1d3   : > { %1920 = vmatpush1.bf16.msra.mxu0 %v1919_v26  ;;  %1167 = vmatprep.mubr.f32.mxu0 %v693_v36  ;;  %v911_v36 = vld [vmem:[#allocation7 + $0x698] sm:$0xff]  ;;  %v1941_v41 = vpack.c.bf16 %v791_v34, %v789_v31  ;;  %v2075_v25 = vpack.c.bf16 %v922_v17, %v920_v16  ;;  %v926_v31 = vld [vmem:[#allocation7 + $0x710] sm:$0xff]  ;;  %v940_v16 = vld [vmem:[#allocation7 + $0x780] sm:$0xff] }
 0x1d4   : > { %1922 = vmatprep.subr.bf16.mxu0 %v1921_v29  ;;  %v904_v29 = vld [vmem:[#allocation7 + $0x660] sm:$0xff]  ;;  %v811_v34 = vld [vmem:[#allocation7 + $0x378] sm:$0xff]  ;;  %v942_v17 = vld [vmem:[#allocation7 + $0x790] sm:$0xff] }
 0x1d5   : > { %v601_v46 = vpop.f32.mrb[4].mxu0 }
 0x1d6   : > { %v603_v50 = vpop.f32.mrb[5].mxu0  ;;  %v694_v57 = vmul.f32 0.0625, %v601_v46  ;;  %v795_v46 = vld [vmem:[#allocation7 + $0x2f8] sm:$0xff] }
 0x1d7   : > { %v695_v51 = vmul.f32 0.0625, %v603_v50  ;;  %1924 = vmatpush1.bf16.msra.mxu0 %v1923_v38  ;;  %v605_v52 = vpop.f32.mrb[6].mxu0  ;;  %v3080_v0 = vpop.f32.mrb[4].mxu1  ;;  %v2059_v38 = vpack.c.bf16 %v906_v30, %v904_v29  ;;  %v2063_v50 = vpack.c.bf16 %v910_v44, %v908_v43  ;;  %v924_v30 = vld [vmem:[#allocation7 + $0x700] sm:$0xff]  ;;  %v930_v44 = vld [vmem:[#allocation7 + $0x730] sm:$0xff] }
 0x1d8   : > { %v606_v58 = vpop.f32.mrb[7].mxu0  ;;  %1926 = vmatprep.subr.bf16.mxu0 %v1925_v42  ;;  %v644_v4 = vpop.f32.mrb[5].mxu1  ;;  %v2061_v42 = vpack.c.bf16 %v911_v36, %v909_v35  ;;  %v794_v52 = vld [vmem:[#allocation7 + $0x2f0] sm:$0xff]  ;;  %v929_v35 = vld [vmem:[#allocation7 + $0x728] sm:$0xff]  ;;  %v931_v36 = vld [vmem:[#allocation7 + $0x738] sm:$0xff] }
 0x1d9   : > { %1238 = vmatprep.mubr.f32.mxu1 %v695_v51  ;;  %v697_v5 = vmul.f32 0.0625, %v644_v4  ;;  %v646_v6 = vpop.f32.mrb[6].mxu1  ;;  %v792_v51 = vld [vmem:[#allocation7 + $0x2e0] sm:$0xff]  ;;  %v799_v58 = vld [vmem:[#allocation7 + $0x318] sm:$0xff] }
 0x1da   : > { %1239 = vmatmul.mubr.f32.vlgmr.msra.gmra.mrb[8].mxu1 %v694_v57  ;;  %v647_v11 = vpop.f32.mrb[7].mxu1  ;;  %v797_v57 = vld [vmem:[#allocation7 + $0x308] sm:$0xff]  ;;  %v1947_v61 = vpack.c.bf16 %v794_v52, %v792_v51  ;;  %v916_v4 = vld [vmem:[#allocation7 + $0x6c0] sm:$0xff]  ;;  %v814_v52 = vld [vmem:[#allocation7 + $0x390] sm:$0xff] }
 0x1db   : > { %1928 = vmatpush1.bf16.msra.mxu0 %v1927_v53  ;;  %2048 = vmatpush1.bf16.msra.mxu1 %v2047_v54  ;;  %v1945_v53 = vpack.c.bf16 %v795_v46, %v793_v45  ;;  %v2065_v54 = vpack.c.bf16 %v915_v48, %v913_v47  ;;  %v1949_v2 = vpack.c.bf16 %v799_v58, %v797_v57  ;;  %v801_v6 = vld [vmem:[#allocation7 + $0x328] sm:$0xff]  ;;  %v928_v43 = vld [vmem:[#allocation7 + $0x720] sm:$0xff]  ;;  %v815_v46 = vld [vmem:[#allocation7 + $0x398] sm:$0xff] }
 0x1dc   : > { %1930 = vmatprep.subr.bf16.mxu0 %v1929_v59  ;;  %2050 = vmatprep.subr.bf16.mxu1 %v2049_v60  ;;  %v917_v59 = vld [vmem:[#allocation7 + $0x6c8] sm:$0xff]  ;;  %v919_v60 = vld [vmem:[#allocation7 + $0x6d8] sm:$0xff]  ;;  %v812_v51 = vld [vmem:[#allocation7 + $0x380] sm:$0xff] }
 0x1dd   : > { %1309 = vmatprep.mubr.f32.mxu1 %v697_v5  ;;  %v3082_v20 = vpop.f32.mrb[8].mxu0  ;;  %v2069_v3 = vpack.c.bf16 %v919_v60, %v917_v59  ;;  %v918_v5 = vld [vmem:[#allocation7 + $0x6d0] sm:$0xff]  ;;  %v813_v45 = vld [vmem:[#allocation7 + $0x388] sm:$0xff]  ;;  %v935_v48 = vld [vmem:[#allocation7 + $0x758] sm:$0xff] }
 0x1de   : > { %v3084_v21 = vpop.f32.mrb[9].mxu0  ;;  %v2071_v11 = vpack.c.bf16 %v918_v5, %v916_v4  ;;  %v933_v47 = vld [vmem:[#allocation7 + $0x748] sm:$0xff]  ;;  %v819_v58 = vld [vmem:[#allocation7 + $0x3b8] sm:$0xff]  ;;  %v936_v4 = vld [vmem:[#allocation7 + $0x760] sm:$0xff] }
 0x1df   : > { %1932 = vmatpush1.bf16.msra.mxu0 %v1931_v7  ;;  %2052 = vmatpush1.bf16.msra.mxu1 %v2051_v8  ;;  %v687_v26 = vpop.f32.mrb[10].mxu0  ;;  %v803_v7 = vld [vmem:[#allocation7 + $0x338] sm:$0xff]  ;;  %v921_v8 = vld [vmem:[#allocation7 + $0x6e8] sm:$0xff]  ;;  %v938_v5 = vld [vmem:[#allocation7 + $0x770] sm:$0xff] }
 0x1e0   : > { %1934 = vmatprep.subr.bf16.mxu0 %v1933_v12  ;;  %2054 = vmatprep.subr.bf16.mxu1 %v2053_v13  ;;  %v688_v33 = vpop.f32.mrb[11].mxu0  ;;  %v800_v12 = vld [vmem:[#allocation7 + $0x320] sm:$0xff]  ;;  %v802_v13 = vld [vmem:[#allocation7 + $0x330] sm:$0xff]  ;;  %v1953_v14 = vpack.c.bf16 %v803_v7, %v801_v6  ;;  %v2073_v15 = vpack.c.bf16 %v923_v9, %v921_v8  ;;  %v817_v57 = vld [vmem:[#allocation7 + $0x3a8] sm:$0xff] }
 0x1e1   : > { %v1955_v24 = vpack.c.bf16 %v802_v13, %v800_v12  ;;  %v804_v26 = vld [vmem:[#allocation7 + $0x340] sm:$0xff]  ;;  %v809_v33 = vld [vmem:[#allocation7 + $0x368] sm:$0xff]  ;;  %v939_v60 = vld [vmem:[#allocation7 + $0x778] sm:$0xff] }
 0x1e2   : > { %v937_v59 = vld [vmem:[#allocation7 + $0x768] sm:$0xff]  ;;  %v823_v7 = vld [vmem:[#allocation7 + $0x3d8] sm:$0xff]  ;;  %v820_v12 = vld [vmem:[#allocation7 + $0x3c0] sm:$0xff] }
 0x1e3   : > { %1936 = vmatpush1.bf16.msra.mxu0 %v1935_v22  ;;  %2056 = vmatpush1.bf16.msra.mxu1 %v2055_v23  ;;  %v925_v22 = vld [vmem:[#allocation7 + $0x708] sm:$0xff]  ;;  %v927_v23 = vld [vmem:[#allocation7 + $0x718] sm:$0xff]  ;;  %v822_v13 = vld [vmem:[#allocation7 + $0x3d0] sm:$0xff] }
 0x1e4   : > { %1938 = vmatprep.subr.bf16.mxu0 %v1937_v27  ;;  %2058 = vmatprep.subr.bf16.mxu1 %v2057_v28  ;;  %v806_v27 = vld [vmem:[#allocation7 + $0x350] sm:$0xff]  ;;  %v1957_v28 = vpack.c.bf16 %v807_v19, %v805_v18  ;;  %v2077_v29 = vpack.c.bf16 %v927_v23, %v925_v22  ;;  %v821_v6 = vld [vmem:[#allocation7 + $0x3c8] sm:$0xff]  ;;  %v943_v9 = vld [vmem:[#allocation7 + $0x798] sm:$0xff] }
 0x1e5   : > { %v941_v8 = vld [vmem:[#allocation7 + $0x788] sm:$0xff]  ;;  %v827_v19 = vld [vmem:[#allocation7 + $0x3f8] sm:$0xff] }
 0x1e6   : > { %v825_v18 = vld [vmem:[#allocation7 + $0x3e8] sm:$0xff]  ;;  %v947_v23 = vld [vmem:[#allocation7 + $0x7b8] sm:$0xff] }
 0x1e7   : > { %1940 = vmatpush1.bf16.msra.mxu0 %v1939_v37  ;;  %2060 = vmatpush1.bf16.msra.mxu1 %v2059_v38  ;;  %v1959_v37 = vpack.c.bf16 %v806_v27, %v804_v26  ;;  %v2079_v38 = vpack.c.bf16 %v926_v31, %v924_v30  ;;  %v945_v22 = vld [vmem:[#allocation7 + $0x7a8] sm:$0xff]  ;;  %v824_v26 = vld [vmem:[#allocation7 + $0x3e0] sm:$0xff]  ;;  %v1977_v27 = vpack.c.bf16 %v827_v19, %v825_v18  ;;  %v946_v31 = vld [vmem:[#allocation7 + $0x7b0] sm:$0xff] }
 0x1e8   : > { %1942 = vmatprep.subr.bf16.mxu0 %v1941_v41  ;;  %2062 = vmatprep.subr.bf16.mxu1 %v2061_v42  ;;  %v1961_v41 = vpack.c.bf16 %v811_v34, %v809_v33  ;;  %v2081_v42 = vpack.c.bf16 %v931_v36, %v929_v35  ;;  %v944_v30 = vld [vmem:[#allocation7 + $0x7a0] sm:$0xff]  ;;  %v949_v33 = vld [vmem:[#allocation7 + $0x7c8] sm:$0xff]  ;;  %v951_v34 = vld [vmem:[#allocation7 + $0x7d8] sm:$0xff] }
 0x1e9   : > { %v2099_v36 = vpack.c.bf16 %v946_v31, %v944_v30  ;;  %v978_v18 = vld [vmem:[#allocation7 + $0x8b0] sm:$0xff]  ;;  %v981_v19 = vld [vmem:[#allocation7 + $0x8c8] sm:$0xff]  ;;  %v984_v31 = vld [vmem:[#allocation7 + $0x8e0] sm:$0xff] }
 0x1eb   : > { %1944 = vmatpush1.bf16.msra.mxu0 %v1943_v49  ;;  %2064 = vmatpush1.bf16.msra.mxu1 %v2063_v50  ;;  %v1963_v49 = vpack.c.bf16 %v810_v40, %v808_v39  ;;  %v2083_v50 = vpack.c.bf16 %v930_v44, %v928_v43  ;;  %v950_v39 = vld [vmem:[#allocation7 + $0x7d0] sm:$0xff]  ;;  %v953_v40 = vld [vmem:[#allocation7 + $0x7e8] sm:$0xff] }
 0x1ec   : > { %1946 = vmatprep.subr.bf16.mxu0 %v1945_v53  ;;  %2066 = vmatprep.subr.bf16.mxu1 %v2065_v54  ;;  %v1965_v53 = vpack.c.bf16 %v815_v46, %v813_v45  ;;  %v2085_v54 = vpack.c.bf16 %v935_v48, %v933_v47  ;;  %v952_v45 = vld [vmem:[#allocation7 + $0x7e0] sm:$0xff]  ;;  %v954_v46 = vld [vmem:[#allocation7 + $0x7f0] sm:$0xff]  ;;  %v957_v47 = vld [vmem:[#allocation7 + $0x808] sm:$0xff] }
 0x1ed   : > { %v959_v48 = vld [vmem:[#allocation7 + $0x818] sm:$0xff] }
 0x1ef   : > { %1948 = vmatpush1.bf16.msra.mxu0 %v1947_v61  ;;  %2068 = vmatpush1.bf16.msra.mxu1 %v2067_v62  ;;  %v1967_v61 = vpack.c.bf16 %v814_v52, %v812_v51  ;;  %v2087_v62 = vpack.c.bf16 %v934_v56, %v932_v55  ;;  %v956_v51 = vld [vmem:[#allocation7 + $0x800] sm:$0xff]  ;;  %v958_v52 = vld [vmem:[#allocation7 + $0x810] sm:$0xff]  ;;  %v699_v56 = vmul.f32 0.0625, %v3084_v21 }
 0x1f0   : > { %1950 = vmatprep.subr.bf16.mxu0 %v1949_v2  ;;  %2070 = vmatprep.subr.bf16.mxu1 %v2069_v3  ;;  %v1969_v2 = vpack.c.bf16 %v819_v58, %v817_v57  ;;  %v2089_v3 = vpack.c.bf16 %v939_v60, %v937_v59  ;;  %v2111_v55 = vpack.c.bf16 %v958_v52, %v956_v51  ;;  %v960_v58 = vld [vmem:[#allocation7 + $0x820] sm:$0xff]  ;;  %v962_v59 = vld [vmem:[#allocation7 + $0x830] sm:$0xff]  ;;  %v965_v60 = vld [vmem:[#allocation7 + $0x848] sm:$0xff] }
 0x1f1   : > { %v998_v51 = vld [vmem:[#allocation7 + $0x950] sm:$0xff]  ;;  %v1001_v52 = vld [vmem:[#allocation7 + $0x968] sm:$0xff] }
 0x1f3   : > { %1952 = vmatpush1.bf16.msra.mxu0 %v1951_v10  ;;  %2072 = vmatpush1.bf16.msra.mxu1 %v2071_v11  ;;  %v1971_v10 = vpack.c.bf16 %v818_v1, %v816_v63  ;;  %v2091_v11 = vpack.c.bf16 %v938_v5, %v936_v4  ;;  %v964_v1 = vld [vmem:[#allocation7 + $0x840] sm:$0xff] }
 0x1f4   : > { %1954 = vmatprep.subr.bf16.mxu0 %v1953_v14  ;;  %2074 = vmatprep.subr.bf16.mxu1 %v2073_v15  ;;  %v1973_v14 = vpack.c.bf16 %v823_v7, %v821_v6  ;;  %v2093_v15 = vpack.c.bf16 %v943_v9, %v941_v8  ;;  %v968_v5 = vld [vmem:[#allocation7 + $0x860] sm:$0xff]  ;;  %v970_v6 = vld [vmem:[#allocation7 + $0x870] sm:$0xff]  ;;  %v973_v7 = vld [vmem:[#allocation7 + $0x888] sm:$0xff] }
 0x1f5   : > { %v975_v8 = vld [vmem:[#allocation7 + $0x898] sm:$0xff]  ;;  %v2123_v9 = vpack.c.bf16 %v970_v6, %v968_v5 }
 0x1f6   : > { %v1015_v5 = vld [vmem:[#allocation7 + $0x9d8] sm:$0xff] }
 0x1f7   : > { %1956 = vmatpush1.bf16.msra.mxu0 %v1955_v24  ;;  %2076 = vmatpush1.bf16.msra.mxu1 %v2075_v25  ;;  %v1975_v24 = vpack.c.bf16 %v822_v13, %v820_v12  ;;  %v2095_v25 = vpack.c.bf16 %v942_v17, %v940_v16  ;;  %v974_v12 = vld [vmem:[#allocation7 + $0x890] sm:$0xff]  ;;  %v977_v13 = vld [vmem:[#allocation7 + $0x8a8] sm:$0xff]  ;;  %v976_v17 = vld [vmem:[#allocation7 + $0x8a0] sm:$0xff] }
 0x1f8   : > { %1958 = vmatprep.subr.bf16.mxu0 %v1957_v28  ;;  %2078 = vmatprep.subr.bf16.mxu1 %v2077_v29  ;;  %v2097_v28 = vpack.c.bf16 %v947_v23, %v945_v22  ;;  %v826_v29 = vld [vmem:[#allocation7 + $0x3f0] sm:$0xff]  ;;  %v983_v22 = vld [vmem:[#allocation7 + $0x8d8] sm:$0xff]  ;;  %v2131_v23 = vpack.c.bf16 %v978_v18, %v976_v17  ;;  %v698_v17 = vmul.f32 0.0625, %v3082_v20  ;;  %v1405_v18 = vld [vmem:[#allocation10 + $0x80] sm:$0xff] }
 0x1f9   : > { %v1979_v35 = vpack.c.bf16 %v826_v29, %v824_v26  ;;  %v982_v26 = vld [vmem:[#allocation7 + $0x8d0] sm:$0xff]  ;;  %v1393_v20 = vld [vmem:[#allocation10 + $0x20] sm:$0xff] }
 0x1fb   : > { %1960 = vmatpush1.bf16.msra.mxu0 %v1959_v37  ;;  %2080 = vmatpush1.bf16.msra.mxu1 %v2079_v38  ;;  %v2101_v37 = vpack.c.bf16 %v951_v34, %v949_v33  ;;  %v948_v38 = vld [vmem:[#allocation7 + $0x7c0] sm:$0xff]  ;;  %v986_v33 = vld [vmem:[#allocation7 + $0x8f0] sm:$0xff]  ;;  %v989_v34 = vld [vmem:[#allocation7 + $0x908] sm:$0xff] }
 0x1fc   : > { %1962 = vmatprep.subr.bf16.mxu0 %v1961_v41  ;;  %2082 = vmatprep.subr.bf16.mxu1 %v2081_v42  ;;  %v955_v41 = vld [vmem:[#allocation7 + $0x7f8] sm:$0xff]  ;;  %v692_v42 = vmul.f32 0.0625, %v3078_v32  ;;  %v2103_v43 = vpack.c.bf16 %v950_v39, %v948_v38  ;;  %v696_v32 = vmul.f32 0.0625, %v3080_v0  ;;  %v988_v38 = vld [vmem:[#allocation7 + $0x900] sm:$0xff]  ;;  %v990_v39 = vld [vmem:[#allocation7 + $0x910] sm:$0xff] }
 0x1fd   : > { %v2105_v44 = vpack.c.bf16 %v955_v41, %v953_v40  ;;  %v971_v0 = vld [vmem:[#allocation7 + $0x878] sm:$0xff]  ;;  %v993_v40 = vld [vmem:[#allocation7 + $0x928] sm:$0xff] }
 0x1fe   : > { %v995_v41 = vld [vmem:[#allocation7 + $0x938] sm:$0xff] }
 0x1ff   : > { %1964 = vmatpush1.bf16.msra.mxu0 %v1963_v49  ;;  %2084 = vmatpush1.bf16.msra.mxu1 %v2083_v50  ;;  %v2107_v49 = vpack.c.bf16 %v954_v46, %v952_v45  ;;  %v2109_v50 = vpack.c.bf16 %v959_v48, %v957_v47  ;;  %v994_v45 = vld [vmem:[#allocation7 + $0x930] sm:$0xff]  ;;  %v997_v46 = vld [vmem:[#allocation7 + $0x948] sm:$0xff]  ;;  %v999_v47 = vld [vmem:[#allocation7 + $0x958] sm:$0xff] }
 0x200   : > { %1966 = vmatprep.subr.bf16.mxu0 %v1965_v53  ;;  %2086 = vmatprep.subr.bf16.mxu1 %v2085_v54  ;;  %v961_v53 = vld [vmem:[#allocation7 + $0x828] sm:$0xff]  ;;  %v963_v54 = vld [vmem:[#allocation7 + $0x838] sm:$0xff] }
 0x201   : > { %v2113_v57 = vpack.c.bf16 %v963_v54, %v961_v53  ;;  %v1003_v53 = vld [vmem:[#allocation7 + $0x978] sm:$0xff] }
 0x203   : > { %1968 = vmatpush1.bf16.msra.mxu0 %v1967_v61  ;;  %2088 = vmatpush1.bf16.msra.mxu1 %v2087_v62  ;;  %v967_v61 = vld [vmem:[#allocation7 + $0x858] sm:$0xff]  ;;  %v2115_v62 = vpack.c.bf16 %v962_v59, %v960_v58 }
 0x204   : > { %1970 = vmatprep.subr.bf16.mxu0 %v1969_v2  ;;  %2090 = vmatprep.subr.bf16.mxu1 %v2089_v3  ;;  %v2117_v63 = vpack.c.bf16 %v967_v61, %v965_v60  ;;  %v966_v2 = vld [vmem:[#allocation7 + $0x850] sm:$0xff]  ;;  %v969_v3 = vld [vmem:[#allocation7 + $0x868] sm:$0xff]  ;;  %v1007_v58 = vld [vmem:[#allocation7 + $0x998] sm:$0xff] }
 0x205   : > { %v2119_v4 = vpack.c.bf16 %v966_v2, %v964_v1  ;;  %v2121_v21 = vpack.c.bf16 %v971_v0, %v969_v3  ;;  %v1004_v61 = vld [vmem:[#allocation7 + $0x980] sm:$0xff]  ;;  %v1011_v1 = vld [vmem:[#allocation7 + $0x9b8] sm:$0xff] }
 0x206   : > { %v1008_v0 = vld [vmem:[#allocation7 + $0x9a0] sm:$0xff] }
 0x207   : > { %1972 = vmatpush1.bf16.msra.mxu0 %v1971_v10  ;;  %2092 = vmatpush1.bf16.msra.mxu1 %v2091_v11  ;;  %v2125_v10 = vpack.c.bf16 %v975_v8, %v973_v7  ;;  %v972_v11 = vld [vmem:[#allocation7 + $0x880] sm:$0xff] }
 0x208   : > { %1974 = vmatprep.subr.bf16.mxu0 %v1973_v14  ;;  %2094 = vmatprep.subr.bf16.mxu1 %v2093_v15  ;;  %v979_v14 = vld [vmem:[#allocation7 + $0x8b8] sm:$0xff]  ;;  %v2127_v15 = vpack.c.bf16 %v974_v12, %v972_v11  ;;  %v1012_v8 = vld [vmem:[#allocation7 + $0x9c0] sm:$0xff] }
 0x209   : > { %v2129_v16 = vpack.c.bf16 %v979_v14, %v977_v13  ;;  %v1019_v11 = vld [vmem:[#allocation7 + $0x9f8] sm:$0xff]  ;;  %v1016_v14 = vld [vmem:[#allocation7 + $0x9e0] sm:$0xff] }
 0x20b   : > { %1976 = vmatpush1.bf16.msra.mxu0 %v1975_v24  ;;  %2096 = vmatpush1.bf16.msra.mxu1 %v2095_v25  ;;  %v2133_v24 = vpack.c.bf16 %v983_v22, %v981_v19  ;;  %v980_v25 = vld [vmem:[#allocation7 + $0x8c0] sm:$0xff]  ;;  %v1406_v19 = vld [vmem:[#allocation10 + $0x88] sm:$0xff] }
 0x20c   : > { %1978 = vmatprep.subr.bf16.mxu0 %v1977_v27  ;;  %2098 = vmatprep.subr.bf16.mxu1 %v2097_v28  ;;  %v985_v27 = vld [vmem:[#allocation7 + $0x8e8] sm:$0xff]  ;;  %v987_v28 = vld [vmem:[#allocation7 + $0x8f8] sm:$0xff]  ;;  %v2135_v29 = vpack.c.bf16 %v982_v26, %v980_v25 }
 0x20d   : > { %v2137_v30 = vpack.c.bf16 %v987_v28, %v985_v27  ;;  %v1389_v22 = vld [vmem:[#allocation10] sm:$0xff]  ;;  %v1407_v25 = vld [vmem:[#allocation10 + $0x90] sm:$0xff]  ;;  %v1408_v26 = vld [vmem:[#allocation10 + $0x98] sm:$0xff] }
 0x20e   : > { %v2177_v28 = vpack.c.bf16 %v1408_v26, %v1407_v25  ;;  %v1495_v25 = vld [vmem:[#allocation13 + $0x10] sm:$0xff]  ;;  %v1496_v26 = vld [vmem:[#allocation13 + $0x18] sm:$0xff] }
 0x20f   : > { %1980 = vmatpush1.bf16.msra.mxu0 %v1979_v35  ;;  %2100 = vmatpush1.bf16.msra.mxu1 %v2099_v36  ;;  %v991_v35 = vld [vmem:[#allocation7 + $0x918] sm:$0xff]  ;;  %v2139_v36 = vpack.c.bf16 %v986_v33, %v984_v31  ;;  %v1409_v31 = vld [vmem:[#allocation10 + $0xa0] sm:$0xff]  ;;  %v1410_v33 = vld [vmem:[#allocation10 + $0xa8] sm:$0xff] }
 0x210   : > { %2102 = vmatprep.subr.bf16.mxu1 %v2101_v37  ;;  %v2141_v37 = vpack.c.bf16 %v991_v35, %v989_v34  ;;  %v2181_v35 = vpack.c.bf16 %v1410_v33, %v1409_v31  ;;  %v1499_v31 = vld [vmem:[#allocation13 + $0x30] sm:$0xff]  ;;  %v1500_v33 = vld [vmem:[#allocation13 + $0x38] sm:$0xff] }
 0x212   : > { %1168 = vmatmul.mubr.f32.vlgmr.msra.gmra.mrb[12].mxu0 %v692_v42  ;;  %v2143_v42 = vpack.c.bf16 %v990_v39, %v988_v38  ;;  %v1412_v38 = vld [vmem:[#allocation10 + $0xb8] sm:$0xff] }
 0x213   : > { %2104 = vmatpush1.bf16.msra.mxu1 %v2103_v43  ;;  %v2145_v43 = vpack.c.bf16 %v995_v41, %v993_v40  ;;  %v1395_v41 = vld [vmem:[#allocation10 + $0x30] sm:$0xff] }
 0x214   : > { %2106 = vmatprep.subr.bf16.mxu1 %v2105_v44  ;;  %v992_v44 = vld [vmem:[#allocation7 + $0x920] sm:$0xff] }
 0x215   : > { %v2147_v48 = vpack.c.bf16 %v994_v45, %v992_v44  ;;  %v1414_v44 = vld [vmem:[#allocation10 + $0xc8] sm:$0xff] }
 0x217   : > { %2108 = vmatpush1.bf16.msra.mxu1 %v2107_v49  ;;  %v2149_v49 = vpack.c.bf16 %v999_v47, %v997_v46  ;;  %v1397_v47 = vld [vmem:[#allocation10 + $0x40] sm:$0xff] }
 0x218   : > { %2110 = vmatprep.subr.bf16.mxu1 %v2109_v50  ;;  %v996_v50 = vld [vmem:[#allocation7 + $0x940] sm:$0xff] }
 0x219   : > { %v2151_v54 = vpack.c.bf16 %v998_v51, %v996_v50  ;;  %v1416_v50 = vld [vmem:[#allocation10 + $0xd8] sm:$0xff] }
 0x21a   : > { %1310 = vmatmul.mubr.f32.vlgmr.msra.gmra.mrb[8].mxu1 %v696_v32  ;;  %v2153_v32 = vpack.c.bf16 %v1003_v53, %v1001_v52  ;;  %v1399_v53 = vld [vmem:[#allocation10 + $0x50] sm:$0xff] }
 0x21b   : > { %2112 = vmatpush1.bf16.msra.mxu1 %v2111_v55  ;;  %1380 = vmatprep.mubr.f32.mxu1 %v699_v56  ;;  %v1000_v55 = vld [vmem:[#allocation7 + $0x960] sm:$0xff]  ;;  %v1002_v56 = vld [vmem:[#allocation7 + $0x970] sm:$0xff] }
 0x21c   : > { %2114 = vmatprep.subr.bf16.mxu1 %v2113_v57  ;;  %v1005_v57 = vld [vmem:[#allocation7 + $0x988] sm:$0xff]  ;;  %v2155_v59 = vpack.c.bf16 %v1002_v56, %v1000_v55 }
 0x21d   : > { %v2157_v60 = vpack.c.bf16 %v1007_v58, %v1005_v57  ;;  %v1418_v55 = vld [vmem:[#allocation10 + $0xe8] sm:$0xff]  ;;  %v1401_v58 = vld [vmem:[#allocation10 + $0x60] sm:$0xff] }
 0x21f   : > { %2116 = vmatpush1.bf16.msra.mxu1 %v2115_v62  ;;  %v1006_v62 = vld [vmem:[#allocation7 + $0x990] sm:$0xff] }
 0x220   : > { %2118 = vmatprep.subr.bf16.mxu1 %v2117_v63  ;;  %v1009_v63 = vld [vmem:[#allocation7 + $0x9a8] sm:$0xff]  ;;  %v2159_v2 = vpack.c.bf16 %v1006_v62, %v1004_v61  ;;  %v1419_v61 = vld [vmem:[#allocation10 + $0xf0] sm:$0xff]  ;;  %v1420_v62 = vld [vmem:[#allocation10 + $0xf8] sm:$0xff] }
 0x221   : > { %v2161_v3 = vpack.c.bf16 %v1011_v1, %v1009_v63  ;;  %v2201_v63 = vpack.c.bf16 %v1420_v62, %v1419_v61  ;;  %v1403_v1 = vld [vmem:[#allocation10 + $0x70] sm:$0xff] }
 0x223   : > { %2120 = vmatpush1.bf16.msra.mxu1 %v2119_v4  ;;  %v1010_v4 = vld [vmem:[#allocation7 + $0x9b0] sm:$0xff] }
 0x224   : > { %2122 = vmatprep.subr.bf16.mxu1 %v2121_v21  ;;  %v1013_v21 = vld [vmem:[#allocation7 + $0x9c8] sm:$0xff]  ;;  %v2163_v6 = vpack.c.bf16 %v1010_v4, %v1008_v0  ;;  %v2709_v0 = vmov 0.0|0.0  }
 0x225   : > { %v2165_v7 = vpack.c.bf16 %v1015_v5, %v1013_v21  ;;  %v1022_v5 = vlaneseq }
 0x227   : > { %2124 = vmatpush1.bf16.msra.mxu1 %v2123_v9  ;;  %v1014_v9 = vld [vmem:[#allocation7 + $0x9d0] sm:$0xff] }
 0x228   : > { %2126 = vmatprep.subr.bf16.mxu1 %v2125_v10  ;;  %v1017_v10 = vld [vmem:[#allocation7 + $0x9e8] sm:$0xff]  ;;  %v2167_v12 = vpack.c.bf16 %v1014_v9, %v1012_v8  ;;  %v1020_v8 = vld [vmem:[#allocation8] sm:$0x3] }
 0x229   : > { %v2169_v13 = vpack.c.bf16 %v1019_v11, %v1017_v10 }
 0x22b   : > { %2128 = vmatpush1.bf16.msra.mxu1 %v2127_v15  ;;  %v1018_v15 = vld [vmem:[#allocation7 + $0x9f0] sm:$0xff] }
 0x22c   : > { %2130 = vmatprep.subr.bf16.mxu1 %v2129_v16  ;;  %v2171_v16 = vpack.c.bf16 %v1018_v15, %v1016_v14 }
 0x22f   : > { %2132 = vmatpush1.bf16.msra.mxu1 %v2131_v23  ;;  %v2173_v23 = vpack.c.bf16 %v1406_v19, %v1405_v18  ;;  %v1494_v18 = vld [vmem:[#allocation13 + $0x8] sm:$0xff] }
 0x230   : > { %2134 = vmatprep.subr.bf16.mxu1 %v2133_v24  ;;  %v1390_v24 = vld [vmem:[#allocation10 + $0x8] sm:$0xff] }
 0x231   : > { %v2175_v27 = vpack.c.bf16 %v1390_v24, %v1389_v22  ;;  %2174 = vmatprep.subr.bf16.mxu0 %v2173_v23 }
 0x233   : > { %2136 = vmatpush1.bf16.msra.mxu1 %v2135_v29  ;;  %v1391_v29 = vld [vmem:[#allocation10 + $0x10] sm:$0xff]  ;;  %2176 = vmatpush3.bf16.msra.mxu0 %v2175_v27  ;;  %v2209_v27 = vpack.c.bf16 %v1496_v26, %v1495_v25 }
 0x234   : > { %2138 = vmatprep.subr.bf16.mxu1 %v2137_v30  ;;  %v1392_v30 = vld [vmem:[#allocation10 + $0x18] sm:$0xff]  ;;  %2178 = vmatprep.subr.bf16.mxu0 %v2177_v28  ;;  %v1497_v28 = vld [vmem:[#allocation13 + $0x20] sm:$0xff] }
 0x235   : > { %v2179_v34 = vpack.c.bf16 %v1392_v30, %v1391_v29  ;;  %v1498_v29 = vld [vmem:[#allocation13 + $0x28] sm:$0xff] }
 0x236   : > { %v2212_v30 = vpack.c.bf16 %v1498_v29, %v1497_v28 }
 0x237   : > { %2140 = vmatpush1.bf16.msra.mxu1 %v2139_v36  ;;  %v1394_v36 = vld [vmem:[#allocation10 + $0x28] sm:$0xff]  ;;  %2180 = vmatpush3.bf16.msra.mxu0 %v2179_v34  ;;  %v2215_v34 = vpack.c.bf16 %v1500_v33, %v1499_v31 }
 0x238   : > { %2142 = vmatprep.subr.bf16.mxu1 %v2141_v37  ;;  %v1411_v37 = vld [vmem:[#allocation10 + $0xb0] sm:$0xff]  ;;  %v2183_v39 = vpack.c.bf16 %v1394_v36, %v1393_v20  ;;  %2182 = vmatprep.subr.bf16.mxu0 %v2181_v35  ;;  %v1501_v35 = vld [vmem:[#allocation13 + $0x40] sm:$0xff] }
 0x239   : > { %v2185_v40 = vpack.c.bf16 %v1412_v38, %v1411_v37  ;;  %v1502_v20 = vld [vmem:[#allocation13 + $0x48] sm:$0xff]  ;;  %v1503_v37 = vld [vmem:[#allocation13 + $0x50] sm:$0xff]  ;;  %v1504_v38 = vld [vmem:[#allocation13 + $0x58] sm:$0xff] }
 0x23a   : > { %v2218_v36 = vpack.c.bf16 %v1502_v20, %v1501_v35 }
 0x23b   : > { %2144 = vmatpush1.bf16.msra.mxu1 %v2143_v42  ;;  %v1396_v42 = vld [vmem:[#allocation10 + $0x38] sm:$0xff]  ;;  %2184 = vmatpush3.bf16.msra.mxu0 %v2183_v39  ;;  %v2221_v39 = vpack.c.bf16 %v1504_v38, %v1503_v37 }
 0x23c   : > { %2146 = vmatprep.subr.bf16.mxu1 %v2145_v43  ;;  %v1413_v43 = vld [vmem:[#allocation10 + $0xc0] sm:$0xff]  ;;  %v2187_v45 = vpack.c.bf16 %v1396_v42, %v1395_v41  ;;  %2186 = vmatprep.subr.bf16.mxu0 %v2185_v40  ;;  %v1506_v41 = vld [vmem:[#allocation13 + $0x68] sm:$0xff] }
 0x23d   : > { %v2189_v46 = vpack.c.bf16 %v1414_v44, %v1413_v43  ;;  %v1505_v40 = vld [vmem:[#allocation13 + $0x60] sm:$0xff]  ;;  %v1507_v43 = vld [vmem:[#allocation13 + $0x70] sm:$0xff]  ;;  %v1508_v44 = vld [vmem:[#allocation13 + $0x78] sm:$0xff] }
 0x23e   : > { %v2224_v42 = vpack.c.bf16 %v1506_v41, %v1505_v40 }
 0x23f   : > { %2148 = vmatpush1.bf16.msra.mxu1 %v2147_v48  ;;  %v1398_v48 = vld [vmem:[#allocation10 + $0x48] sm:$0xff]  ;;  %2188 = vmatpush3.bf16.msra.mxu0 %v2187_v45  ;;  %v2227_v45 = vpack.c.bf16 %v1508_v44, %v1507_v43 }
 0x240   : > { %2150 = vmatprep.subr.bf16.mxu1 %v2149_v49  ;;  %v1415_v49 = vld [vmem:[#allocation10 + $0xd0] sm:$0xff]  ;;  %v2191_v51 = vpack.c.bf16 %v1398_v48, %v1397_v47  ;;  %2190 = vmatprep.subr.bf16.mxu0 %v2189_v46  ;;  %v2711_v46 = vmov 0.0   ;;  %v1421_v48 = vld [vmem:[#allocation11] sm:$0x1] }
 0x241   : > { %v2193_v52 = vpack.c.bf16 %v1416_v50, %v1415_v49 }
 0x243   : > { %2152 = vmatpush1.bf16.msra.mxu1 %v2151_v54  ;;  %v1400_v54 = vld [vmem:[#allocation10 + $0x58] sm:$0xff]  ;;  %2192 = vmatpush3.bf16.msra.mxu0 %v2191_v51 }
 0x244   : > { %2154 = vmatprep.subr.bf16.mxu1 %v2153_v32  ;;  %v1417_v32 = vld [vmem:[#allocation10 + $0xe0] sm:$0xff]  ;;  %v2195_v56 = vpack.c.bf16 %v1400_v54, %v1399_v53  ;;  %2194 = vmatprep.subr.bf16.mxu0 %v2193_v52 }
 0x245   : > { %v2197_v57 = vpack.c.bf16 %v1418_v55, %v1417_v32  ;;  %v1509_v53 = vld [vmem:[#allocation14] sm:$0x1] }
 0x247   : > { %2156 = vmatpush1.bf16.msra.mxu1 %v2155_v59  ;;  %2196 = vmatpush3.bf16.msra.mxu0 %v2195_v56  ;;  %v1402_v59 = vld [vmem:[#allocation10 + $0x68] sm:$0xff] }
 0x248   : > { %2158 = vmatprep.subr.bf16.mxu1 %v2157_v60  ;;  %2198 = vmatprep.subr.bf16.mxu0 %v2197_v57  ;;  %v2199_v60 = vpack.c.bf16 %v1402_v59, %v1401_v58 }
 0x24b   : > { %2160 = vmatpush1.bf16.msra.mxu1 %v2159_v2  ;;  %2200 = vmatpush3.bf16.msra.mxu0 %v2199_v60  ;;  %v1404_v2 = vld [vmem:[#allocation10 + $0x78] sm:$0xff] }
 0x24c   : > { %2162 = vmatprep.subr.bf16.mxu1 %v2161_v3  ;;  %v2203_v3 = vpack.c.bf16 %v1404_v2, %v1403_v1  ;;  %2202 = vmatprep.subr.bf16.mxu0 %v2201_v63 }
 0x24f   : > { %2164 = vmatpush1.bf16.msra.mxu1 %v2163_v6  ;;  %2204 = vmatpush3.bf16.msra.mxu0 %v2203_v3  ;;  %v1023_v6 = vshrl.u32 %v1022_v5, 7 }
 0x250   : > { %2166 = vmatprep.subr.bf16.mxu1 %v2165_v7  ;;  %2205 = vmatprep.subr.bf16.mxu0 %v2709_v0 }
 0x251   : > { %v1024_v7 = vsub.s32 0, %v1023_v6  ;;  %v1028_v9 = vsub.s32 1, %v1023_v6 }
 0x253   : > { %2168 = vmatpush1.bf16.msra.mxu1 %v2167_v12  ;;  %v1025_v10 = vrot.slane %v1020_v8, %v1024_v7  ;;  %v1029_v11 = vrot.slane %v1020_v8, %v1028_v9 }
 0x254   : > { %2170 = vmatprep.subr.bf16.mxu1 %v2169_v13 }
 0x257   : > { %2172 = vmatpush1.bf16.msra.mxu1 %v2171_v16 }
 0x25a   : > { %1381 = vmatmul.mubr.f32.vlgmr.msra.gmra.mrb[8].mxu1 %v698_v17  ;;  %v1493_v17 = vld [vmem:[#allocation13] sm:$0xff] }
 0x25b   : > { %v2206_v23 = vpack.c.bf16 %v1494_v18, %v1493_v17 }
 0x2e5   : > { %v1169_v4 = vpop.f32.mrb[12].mxu0 }
 0x2e6   : > { %v1171_v21 = vpop.f32.mrb[13].mxu0  ;;  %v2229_v12 = vadd.f32 %v1169_v4, %v1025_v10 }
 0x2e7   : > { %v2231_v13 = vadd.f32 %v1171_v21, %v1029_v11 }
 0x32d   : > { %v1382_v14 = vpop.f32.mrb[8].mxu1 }
 0x32e   : > { %v2230_v15 = vadd.f32 %v2229_v12, %v1382_v14  ;;  %v1384_v16 = vpop.f32.mrb[9].mxu1 }
 0x32f   : > { %v2232_v19 = vadd.f32 %v2231_v13, %v1384_v16 }
 0x330   : > { %v1387_v24 = vmax.f32 %v2230_v15, 0.0 }
 0x331   : > { %v1388_v22 = vmax.f32 %v2232_v19, 0.0 }
 0x333   : > { %1486 = vmatprep.mubr.f32.mxu0 %v1388_v22 }
 0x334   : > { %1487 = vmatmul.mubr.f32.vlgmr.msra.gmra.mrb[14].mxu0 %v1387_v24 }
 0x335   : > { %2207 = vmatpush3.bf16.msra.mxu0 %v2206_v23  ;;  %1850 = vmatprep.mubr.msk.f32.mxu0 %vm2710_vm1, %v2711_v46 }
 0x336   : > { %2208 = vmatprep.subr.bf16.mxu0 %v2709_v0 }
 0x339   : > { %2210 = vmatpush3.bf16.msra.mxu0 %v2209_v27 }
 0x33a   : > { %2211 = vmatprep.subr.bf16.mxu0 %v2709_v0 }
 0x33d   : > { %2213 = vmatpush3.bf16.msra.mxu0 %v2212_v30 }
 0x33e   : > { %2214 = vmatprep.subr.bf16.mxu0 %v2709_v0 }
 0x341   : > { %2216 = vmatpush3.bf16.msra.mxu0 %v2215_v34 }
 0x342   : > { %2217 = vmatprep.subr.bf16.mxu0 %v2709_v0 }
 0x345   : > { %2219 = vmatpush3.bf16.msra.mxu0 %v2218_v36 }
 0x346   : > { %2220 = vmatprep.subr.bf16.mxu0 %v2709_v0 }
 0x349   : > { %2222 = vmatpush3.bf16.msra.mxu0 %v2221_v39 }
 0x34a   : > { %2223 = vmatprep.subr.bf16.mxu0 %v2709_v0 }
 0x34d   : > { %2225 = vmatpush3.bf16.msra.mxu0 %v2224_v42 }
 0x34e   : > { %2226 = vmatprep.subr.bf16.mxu0 %v2709_v0 }
 0x351   : > { %2228 = vmatpush3.bf16.msra.mxu0 %v2227_v45 }
 0x407   : > { %v1798_v47 = vpop.f32.mrb[14].mxu0 }
 0x408   : > { %v1799_v49 = vpop.f32.mrb[15].mxu0 }
 0x409   : > { %v1800_v50 = vadd.f32 %v1799_v49, %v1798_v47 }
 0x40b   : > { %v1489_v51 = vadd.f32 %v1800_v50, %v1421_v48 }
 0x40d   : > { %v1492_v52 = vmax.f32 %v1489_v51, 0.0 }
 0x40f   : > { %1851 = vmatmul.mubr.f32.vlgmr.msra.gmra.mrb[16].mxu0 %v1492_v52 }
 0x4e2   : > { %v1576_v54 = vpop.f32.mrb[16].mxu0 }
 0x4e3   : > { %v1577_v32 = vadd.f32 %v1576_v54, %v1509_v53  ;;  %v1852_v55 = vpop.f32.mrb[17].mxu0 }
 0x4e5   : > { %1580 = vst [vmem:[%s417_s10] sm:$0x1] %v1577_v32 }
 0x4e6   : > { %2623 = shalt.err (!%p2620_p11)
}
 0x4e7   : > { %s2624_s18 = scalar_lea.hbm %s3095_s20, 16  ;;  %s2628_s26 = scalar_lea.hbm %s3147_s8, 32 }
 0x4e8   : > { %p2625_p12 = scmp.ne.s32.totalorder %s3095_s20, %s2624_s18  ;;  %p2629_p9 = scmp.lt.u32.totalorder %s3095_s20, %s3147_s8 }
 0x4e9   : > { %p2630_p7 = scmp.lt.u32.totalorder %s2628_s26, %s2624_s18  ;;  %p2632_p4 = scmp.lt.u32.totalorder %s2624_s18, %s3095_s20 }
 0x4ea   : > { %p2626_p3 = pnand %p2625_p12, %p3172_p1 }
 0x4eb   : > { %p2631_p10 = por %p2630_p7, %p2629_p9 }
 0x4ec   : > { %p2627_p5 = pneg %p2626_p3 }
 0x4ed   : > { %p2633_p13 = por %p2632_p4, %p2631_p10 }
 0x4ef   : > { %p2634_p0 = pnand %p2633_p13, %p2627_p5 }
 0x4f1   : > { %2637 = shalt.err (!%p2634_p0)
}
 0x4f2   : > { %2272 = dma.vmem_to_hbm [thread:$0]  (%p3172_p1), %s3097_s21, 16, %s3095_s20, %s1582_s15  }
 0x4f3 PF: > { %s1606_s10 = sand.u32 1, %s2680_s27   ;;  %p3173_p2 = scmp.ne.s32.totalorder %s3161_s2, 0 }
 0x4f4   : > { %p3174_p8 = scmp.ge.s32.totalorder %s2692_s30, 2  ;;  %s1607_s9 = scalar_lea.sflag [#allocation4], %s1606_s10 }
 0x4f6   : > { %p2301_p6 = pnand %p3174_p8, %p3173_p2 }
 0x4f8   : > { %2675 = dma.done.wait (!%p2301_p6), %s1607_s9, 16  }
 0x4f9   : > { %2677 = vsyncadd (!%p2301_p6), %s1607_s9, 4294967280  ;;  %p25_p11 = scmp.ge.s32.totalorder %s2957_s17, 4   ;;  %s3175_s27 = smov %s2684_s28 }
 0x4fa   : > { %s3176_s28 = smov %s2688_s29  ;;  %s3177_s29 = smov %s2969_s13 }
 0x4fb   : > { %s3178_s30 = smov %s2957_s17  ;;  %27 = sbr.rel (!%p25_p11) target bundleno = 12 (0xc), region = 125 }
 0x502   :  { %1611 = vsyncpa [#allocation3], 1 }
 0x503   :  { %1613 = vsyncpa [#allocation3 + $0x1], 1 }
 0x504   :  { %1614 = vsyncpa [#allocation6], 1 }
 0x505   :  { %1615 = vsyncpa [#allocation9], 1 }
 0x506   :  { %1616 = vsyncpa [#allocation12], 1 }
 0x507   :  { %1617 = vsyncpa [#allocation15], 1 }
 0x508   :  { %1618 = vsyncpa [#allocation4], 1 }
 0x509   :  { %1620 = vsyncpa [#allocation4 + $0x1], 1 }

</bundles_post_ra>
